<compile_context>
chip_gen: v6e
topology: v6e:2x2x1
jax: 0.10.0
libtpu: 0.0.40
codegen_flags: <defaults>
</compile_context>

<pallas_src>
import functools

import jax
import jax.numpy as jnp
from jax.experimental import pallas as pl
from jax.experimental.pallas import tpu as pltpu


def _round_up(x, m):
    return (x + m - 1) // m * m


def _vmem_budget_bytes():
    # Generation-aware scoped-VMEM budget (~3/4 of physical VMEM); fallback is
    # a value that is safe on every listed generation (v5e/v6e/v7x).
    try:
        info = pltpu.get_tpu_info()
        cap = int(getattr(info, "vmem_capacity_bytes", 0) or 0)
        if cap > 0:
            return (cap * 3) // 4
    except Exception:
        pass
    return 32 * 1024 * 1024


VMEM_BUDGET = _vmem_budget_bytes()


# ----------------------------------------------------------------------------
# Pallas kernels 1a/1b: tiled matmul + bias + optional ReLU (conv hot path)
# ----------------------------------------------------------------------------
def _mm_single_kernel(a_ref, b_ref, bias_ref, o_ref, *, relu):
    # Single K step: no accumulator scratch, no init/finalize predication.
    out = jnp.dot(a_ref[...], b_ref[...], preferred_element_type=jnp.float32)
    out = out + bias_ref[...]                      # bias [1, tn] broadcasts
    if relu:
        out = jnp.maximum(out, 0.0)
    o_ref[...] = out.astype(o_ref.dtype)


def _mm_multi_kernel(a_ref, b_ref, bias_ref, o_ref, acc_ref, *, relu):
    @pl.when(pl.program_id(2) == 0)
    def _():
        acc_ref[...] = jnp.zeros_like(acc_ref)

    acc_ref[...] += jnp.dot(a_ref[...], b_ref[...],
                            preferred_element_type=jnp.float32)

    @pl.when(pl.program_id(2) == pl.num_programs(2) - 1)
    def _():
        out = acc_ref[...] + bias_ref[...]
        if relu:
            out = jnp.maximum(out, 0.0)
        o_ref[...] = out.astype(o_ref.dtype)


def matmul_bias_act(a, b, bias, relu=False, out_dtype=jnp.bfloat16):
    """(M,K) @ (K,N) + bias, optional ReLU.  bf16 MXU operands, f32 accumulate."""
    M, K = a.shape
    K2, N = b.shape
    assert K == K2

    # Large M tiles (parallelism at real sizes comes from the M/N grid);
    # lane-dense N; K is NOT padded when it fits in a single full-extent block.
    tm = min(512, _round_up(M, 8))
    tn = min(256, _round_up(N, 128))
    if K <= 1024:
        tk, Kp = K, K
    else:
        tk = 512
        Kp = _round_up(K, tk)
    Mp, Np = _round_up(M, tm), _round_up(N, tn)

    a_p = a.astype(jnp.bfloat16)
    b_p = b.astype(jnp.bfloat16)
    if (Mp, Kp) != (M, K):
        a_p = jnp.pad(a_p, ((0, Mp - M), (0, Kp - K)))
    if (Kp, Np) != (K, N):
        b_p = jnp.pad(b_p, ((0, Kp - K), (0, Np - N)))
    bias_p = jnp.pad(bias.astype(jnp.float32), (0, Np - N)).reshape(1, Np)

    if Kp == tk:
        out = pl.pallas_call(
            functools.partial(_mm_single_kernel, relu=relu),
            out_shape=jax.ShapeDtypeStruct((Mp, Np), out_dtype),
            grid=(Mp // tm, Np // tn),
            in_specs=[
                pl.BlockSpec((tm, tk), lambda i, j: (i, 0)),
                pl.BlockSpec((tk, tn), lambda i, j: (0, j)),
                pl.BlockSpec((1, tn), lambda i, j: (0, j)),
            ],
            out_specs=pl.BlockSpec((tm, tn), lambda i, j: (i, j)),
            compiler_params=pltpu.CompilerParams(
                dimension_semantics=("parallel", "parallel"),
                vmem_limit_bytes=VMEM_BUDGET),
        )(a_p, b_p, bias_p)
    else:
        out = pl.pallas_call(
            functools.partial(_mm_multi_kernel, relu=relu),
            out_shape=jax.ShapeDtypeStruct((Mp, Np), out_dtype),
            grid=(Mp // tm, Np // tn, Kp // tk),
            in_specs=[
                pl.BlockSpec((tm, tk), lambda i, j, k: (i, k)),
                pl.BlockSpec((tk, tn), lambda i, j, k: (k, j)),
                pl.BlockSpec((1, tn), lambda i, j, k: (0, j)),
            ],
            out_specs=pl.BlockSpec((tm, tn), lambda i, j, k: (i, j)),
            scratch_shapes=[pltpu.VMEM((tm, tn), jnp.float32)],
            compiler_params=pltpu.CompilerParams(
                dimension_semantics=("parallel", "parallel", "arbitrary"),
                vmem_limit_bytes=VMEM_BUDGET),
        )(a_p, b_p, bias_p)
    return out[:M, :N]


# ----------------------------------------------------------------------------
# Conv2d (PyTorch semantics) in NHWC = im2col (glue) + Pallas matmul
# ----------------------------------------------------------------------------
def conv2d_nhwc(x, w, b, stride, padding, relu=False):
    # x: [N, H, W, Cin];  w: [Cout, Cin, kh, kw] (PyTorch layout);  b: [Cout]
    N, H, W, Cin = x.shape
    Cout, _, kh, kw = w.shape
    Ho = (H + 2 * padding - kh) // stride + 1
    Wo = (W + 2 * padding - kw) // stride + 1

    if kh == 1 and kw == 1 and stride == 1 and padding == 0:
        a = x.reshape(N * H * W, Cin)
        wmat = w.reshape(Cout, Cin).T
    else:
        xp = jnp.pad(x, ((0, 0), (padding, padding), (padding, padding), (0, 0)))
        cols = []
        for i in range(kh):
            for j in range(kw):
                cols.append(xp[:, i:i + stride * Ho:stride,
                               j:j + stride * Wo:stride, :])
        a = jnp.concatenate(cols, axis=-1).reshape(N * Ho * Wo, kh * kw * Cin)
        # weight rows ordered (ki, kj, cin) to match the patch layout above
        wmat = jnp.transpose(w, (2, 3, 1, 0)).reshape(kh * kw * Cin, Cout)

    out = matmul_bias_act(a, wmat, b, relu=relu)        # Pallas kernel (bf16 out)
    return out.reshape(N, Ho, Wo, Cout)


# ----------------------------------------------------------------------------
# Bilinear interpolation matrices (align_corners=False, matches F.interpolate)
# ----------------------------------------------------------------------------
def _interp_matrix(out_size, in_size):
    if in_size == 1:
        return jnp.ones((out_size, 1), jnp.float32)
    scale = in_size / out_size
    dst = jnp.arange(out_size, dtype=jnp.float32)
    src = jnp.clip((dst + 0.5) * scale - 0.5, 0.0, in_size - 1)
    x0 = jnp.floor(src)
    x1 = jnp.minimum(x0 + 1.0, in_size - 1)
    w1 = src - x0
    w0 = 1.0 - w1
    m = jnp.zeros((out_size, in_size), jnp.float32)
    rows = jnp.arange(out_size)
    m = m.at[rows, x0.astype(jnp.int32)].add(w0)
    m = m.at[rows, x1.astype(jnp.int32)].add(w1)
    return m


# ----------------------------------------------------------------------------
# Pallas kernel 2: fused 1x1 classifier + bias + bilinear resize
#   class-major, tiled over output rows, emits NCHW with lane-dense width
# ----------------------------------------------------------------------------
def _head_kernel(feat_ref, w_ref, b_ref, rh_ref, rw_ref, o_ref, *, h, w):
    # feat_ref: [1, C, h*w] bf16 (class-major features, spatial flattened)
    # w_ref:    [CLSp, C]  bf16     b_ref: [CLSp, 1] f32
    # rh_ref:   [t_ho, h]  bf16 (this tile's rows of the height interp matrix)
    # rw_ref:   [w, Wop]   bf16 (transposed width interp matrix, lane padded)
    # o_ref:    [1, CLSp, t_ho, Wop] f32  (NCHW tile, Wop lane-dense)
    CLSp = w_ref.shape[0]
    t_ho = rh_ref.shape[0]
    Wop = rw_ref.shape[1]

    # 1x1 classifier conv (channel mix) in class-major layout + bias (f32 acc).
    ym = jnp.dot(w_ref[...], feat_ref[0], preferred_element_type=jnp.float32)
    ym = ym + b_ref[...]                                       # [CLSp, h*w]
    ym3 = ym.reshape(CLSp, h, w).astype(jnp.bfloat16)

    # Height pass restricted to this tile's output rows (batched over classes).
    rhb = jnp.broadcast_to(rh_ref[...][None, :, :], (CLSp, t_ho, h))
    t3 = jnp.einsum('cth,chw->ctw', rhb, ym3,
                    preferred_element_type=jnp.float32)        # [CLSp, t_ho, w]

    # Width pass: one lane-dense matmul producing the NCHW tile directly.
    t2 = t3.reshape(CLSp * t_ho, w).astype(jnp.bfloat16)
    out = jnp.dot(t2, rw_ref[...], preferred_element_type=jnp.float32)
    o_ref[0] = out.reshape(CLSp, t_ho, Wop)


def classifier_head(feat_nhwc, w, b, out_hw):
    # feat: [N, h, w, C];  w: [CLS, C, 1, 1];  b: [CLS]  ->  [N, CLS, Ho, Wo] f32
    N, h, wd, C = feat_nhwc.shape
    CLS = w.shape[0]
    Ho, Wo = out_hw

    CLSp = _round_up(CLS, 8)          # sublane-pad the (small) class dim
    Wop = _round_up(Wo, 128)          # lane-dense output width (NCHW minor dim)

    # Output-row tile: keep the (double-buffered f32) output tile well under the
    # VMEM budget, and keep >=2 tiles when possible so a single image can split
    # across v7x's two TensorCores.
    bytes_per_row = CLSp * Wop * 4 * 2
    max_rows = max(8, (VMEM_BUDGET // 8) // bytes_per_row)
    t_ho = max(8, min(256, _round_up((Ho + 1) // 2, 8), (max_rows // 8) * 8))
    Hop = _round_up(Ho, t_ho)

    wT = jnp.pad(w.reshape(CLS, C), ((0, CLSp - CLS), (0, 0))).astype(jnp.bfloat16)
    biasp = jnp.pad(b.astype(jnp.float32), (0, CLSp - CLS)).reshape(CLSp, 1)
    rh = jnp.pad(_interp_matrix(Ho, h),
                 ((0, Hop - Ho), (0, 0))).astype(jnp.bfloat16)        # [Hop, h]
    rwT = jnp.pad(_interp_matrix(Wo, wd).T,
                  ((0, 0), (0, Wop - Wo))).astype(jnp.bfloat16)       # [wd, Wop]

    # Small glue: features to class-major [N, C, h*w] (kernel then needs no
    # in-kernel transpose and emits NCHW directly).
    featC = jnp.transpose(feat_nhwc, (0, 3, 1, 2)).reshape(N, C, h * wd)
    featC = featC.astype(jnp.bfloat16)

    kernel = functools.partial(_head_kernel, h=h, w=wd)
    out = pl.pallas_call(
        kernel,
        out_shape=jax.ShapeDtypeStruct((N, CLSp, Hop, Wop), jnp.float32),
        grid=(N, Hop // t_ho),
        in_specs=[
            pl.BlockSpec((1, C, h * wd), lambda n, t: (n, 0, 0)),
            pl.BlockSpec((CLSp, C), lambda n, t: (0, 0)),
            pl.BlockSpec((CLSp, 1), lambda n, t: (0, 0)),
            pl.BlockSpec((t_ho, h), lambda n, t: (t, 0)),
            pl.BlockSpec((wd, Wop), lambda n, t: (0, 0)),
        ],
        out_specs=pl.BlockSpec((1, CLSp, t_ho, Wop), lambda n, t: (n, 0, t, 0)),
        compiler_params=pltpu.CompilerParams(
            dimension_semantics=("parallel", "parallel"),
            vmem_limit_bytes=VMEM_BUDGET),
    )(featC, wT, biasp, rh, rwT)

    # Drop class / spatial padding; result is already NCHW.
    return out[:, :CLS, :Ho, :Wo]


# ----------------------------------------------------------------------------
# Deterministic parameter init (synthetic weights, PyTorch layouts)
# ----------------------------------------------------------------------------
def init_params(key, in_ch=4, c1=8, c2=16, num_classes=3):
    ks = jax.random.split(key, 8)

    def w_init(k, shape, fan_in):
        return jax.random.normal(k, shape, jnp.float32) * (1.0 / fan_in) ** 0.5

    def b_init(k, n):
        return jax.random.normal(k, (n,), jnp.float32) * 0.01

    return {
        "conv1_w": w_init(ks[0], (c1, in_ch, 3, 3), in_ch * 9),
        "conv1_b": b_init(ks[1], c1),
        "conv2_w": w_init(ks[2], (c2, c1, 3, 3), c1 * 9),
        "conv2_b": b_init(ks[3], c2),
        "cls_w":   w_init(ks[4], (num_classes, c2, 1, 1), c2),
        "cls_b":   b_init(ks[5], num_classes),
        "aux_w":   w_init(ks[6], (num_classes, c1, 1, 1), c1),
        "aux_b":   b_init(ks[7], num_classes),
    }


# ----------------------------------------------------------------------------
# DeepLabV3 forward (matches the PyTorch module's forward semantics)
# ----------------------------------------------------------------------------
def deeplabv3_forward(params, x_nchw):
    input_shape = x_nchw.shape[-2:]
    x = jnp.transpose(x_nchw, (0, 2, 3, 1))            # NCHW -> NHWC once

    # backbone -> {'aux': mid features, 'out': last features}  (NHWC, bf16)
    f1 = conv2d_nhwc(x, params["conv1_w"], params["conv1_b"],
                     stride=2, padding=1, relu=True)
    f2 = conv2d_nhwc(f1, params["conv2_w"], params["conv2_b"],
                     stride=2, padding=1, relu=True)
    features = {"aux": f1, "out": f2}

    result = {}
    # classifier + bilinear resize (fused, row-tiled Pallas kernel), NCHW out
    result["out"] = classifier_head(features["out"], params["cls_w"],
                                    params["cls_b"], input_shape)
    # aux_classifier branch
    result["aux"] = classifier_head(features["aux"], params["aux_w"],
                                    params["aux_b"], input_shape)
    return result


if __name__ == "__main__":
    key = jax.random.PRNGKey(0)
    k_param, k_x = jax.random.split(key)
    params = init_params(k_param)

    # PyTorch-style NCHW input: batch=2, channels=4, spatial=16x16
    x = jax.random.normal(k_x, (2, 4, 16, 16), jnp.float32)

    fwd = jax.jit(deeplabv3_forward)
    out = fwd(params, x)
    jax.block_until_ready(out["out"])
    jax.block_until_ready(out["aux"])

    assert out["out"].shape == (2, 3, 16, 16)
    assert out["aux"].shape == (2, 3, 16, 16)
    print("KERNEL_OK")
</pallas_src>

<mosaic_0001>
module attributes {stable_mosaic.version = 11 : i64} {
  func.func private @main(%arg0: i32) attributes {dimension_semantics = [#tpu.dimension_semantics<core_parallel>], iteration_bounds = array<i64: 2>, tpu.core_type = #tpu.core_type<sc_scalar_subcore>, window_params = []} {
    return
  }
}

module attributes {stable_mosaic.version = 11 : i64} {
  func.func private @main(%arg0: i32) attributes {dimension_semantics = [#tpu.dimension_semantics<core_parallel>], iteration_bounds = array<i64: 2>, tpu.core_type = #tpu.core_type<sc_scalar_subcore>, window_params = []} {
    return
  }
}

module attributes {stable_mosaic.version = 11 : i64} {
  func.func @_mm_single_kernel(%arg0: i32, %arg1: i32, %arg2: memref<128x36xbf16, #tpu.memory_space<vmem>>, %arg3: memref<36x128xbf16, #tpu.memory_space<vmem>>, %arg4: memref<1x128xf32, #tpu.memory_space<vmem>>, %arg5: memref<128x128xbf16, #tpu.memory_space<vmem>>) attributes {dimension_semantics = [#tpu.dimension_semantics<parallel>, #tpu.dimension_semantics<parallel>], iteration_bounds = array<i64: 1, 1>, scalar_prefetch = 0 : i64, scratch_operands = 0 : i64, tpu.core_type = #tpu.core_type<tc>, window_params = [{transform_indices = @transform_0, window_bounds = array<i64: 128, 36>}, {transform_indices = @transform_1, window_bounds = array<i64: 36, 128>}, {transform_indices = @transform_2, window_bounds = array<i64: 1, 128>}, {transform_indices = @transform_3, window_bounds = array<i64: 128, 128>}]} {
    %c0 = arith.constant 0 : index
    %c0_0 = arith.constant 0 : index
    %0 = vector.load %arg2[%c0, %c0_0] : memref<128x36xbf16, #tpu.memory_space<vmem>>, vector<128x36xbf16>
    %c0_1 = arith.constant 0 : index
    %c0_2 = arith.constant 0 : index
    %1 = vector.load %arg3[%c0_1, %c0_2] : memref<36x128xbf16, #tpu.memory_space<vmem>>, vector<36x128xbf16>
    %cst = arith.constant dense<0.000000e+00> : vector<128x128xf32>
    %2 = tpu.matmul %0, %1, %cst {dimension_numbers = #tpu.dot_dimension_numbers<[1], [0], [0], [1], [0, 0, 1, 1], [], []>} : vector<128x36xbf16>, vector<36x128xbf16>, vector<128x128xf32> -> vector<128x128xf32>
    %c0_3 = arith.constant 0 : index
    %c0_4 = arith.constant 0 : index
    %3 = vector.load %arg4[%c0_3, %c0_4] : memref<1x128xf32, #tpu.memory_space<vmem>>, vector<1x128xf32>
    %4 = vector.broadcast %3 : vector<1x128xf32> to vector<128x128xf32>
    %5 = arith.addf %2, %4 : vector<128x128xf32>
    %cst_5 = arith.constant 0.000000e+00 : f32
    %6 = vector.broadcast %cst_5 : f32 to vector<128x128xf32>
    %7 = arith.maximumf %5, %6 : vector<128x128xf32>
    %8 = arith.truncf %7 : vector<128x128xf32> to vector<128x128xbf16>
    %c0_6 = arith.constant 0 : index
    %c0_7 = arith.constant 0 : index
    %9 = vector.load %arg5[%c0_6, %c0_7] : memref<128x128xbf16, #tpu.memory_space<vmem>>, vector<128x128xbf16>
    tpu.vector_store %arg5[%c0_6, %c0_7], %8 {strides = array<i32>} : memref<128x128xbf16, #tpu.memory_space<vmem>>, vector<128x128xbf16>,
    return
  }
  func.func @transform_0(%arg0: i32, %arg1: i32) -> (i32, i32) {
    %c0_i32 = arith.constant 0 : i32
    %c0_i32_0 = arith.constant 0 : i32
    return %arg0, %c0_i32 : i32, i32
  }
  func.func @transform_1(%arg0: i32, %arg1: i32) -> (i32, i32) {
    %c0_i32 = arith.constant 0 : i32
    %c0_i32_0 = arith.constant 0 : i32
    return %c0_i32, %arg1 : i32, i32
  }
  func.func @transform_2(%arg0: i32, %arg1: i32) -> (i32, i32) {
    %c0_i32 = arith.constant 0 : i32
    %c0_i32_0 = arith.constant 0 : i32
    return %c0_i32, %arg1 : i32, i32
  }
  func.func @transform_3(%arg0: i32, %arg1: i32) -> (i32, i32) {
    %c0_i32 = arith.constant 0 : i32
    return %arg0, %arg1 : i32, i32
  }
}

module attributes {stable_mosaic.version = 11 : i64} {
  func.func @_mm_single_kernel(%arg0: i32, %arg1: i32, %arg2: memref<32x72xbf16, #tpu.memory_space<vmem>>, %arg3: memref<72x128xbf16, #tpu.memory_space<vmem>>, %arg4: memref<1x128xf32, #tpu.memory_space<vmem>>, %arg5: memref<32x128xbf16, #tpu.memory_space<vmem>>) attributes {dimension_semantics = [#tpu.dimension_semantics<parallel>, #tpu.dimension_semantics<parallel>], iteration_bounds = array<i64: 1, 1>, scalar_prefetch = 0 : i64, scratch_operands = 0 : i64, tpu.core_type = #tpu.core_type<tc>, window_params = [{transform_indices = @transform_0, window_bounds = array<i64: 32, 72>}, {transform_indices = @transform_1, window_bounds = array<i64: 72, 128>}, {transform_indices = @transform_2, window_bounds = array<i64: 1, 128>}, {transform_indices = @transform_3, window_bounds = array<i64: 32, 128>}]} {
    %c0 = arith.constant 0 : index
    %c0_0 = arith.constant 0 : index
    %0 = vector.load %arg2[%c0, %c0_0] : memref<32x72xbf16, #tpu.memory_space<vmem>>, vector<32x72xbf16>
    %c0_1 = arith.constant 0 : index
    %c0_2 = arith.constant 0 : index
    %1 = vector.load %arg3[%c0_1, %c0_2] : memref<72x128xbf16, #tpu.memory_space<vmem>>, vector<72x128xbf16>
    %cst = arith.constant dense<0.000000e+00> : vector<32x128xf32>
    %2 = tpu.matmul %0, %1, %cst {dimension_numbers = #tpu.dot_dimension_numbers<[1], [0], [0], [1], [0, 0, 1, 1], [], []>} : vector<32x72xbf16>, vector<72x128xbf16>, vector<32x128xf32> -> vector<32x128xf32>
    %c0_3 = arith.constant 0 : index
    %c0_4 = arith.constant 0 : index
    %3 = vector.load %arg4[%c0_3, %c0_4] : memref<1x128xf32, #tpu.memory_space<vmem>>, vector<1x128xf32>
    %4 = vector.broadcast %3 : vector<1x128xf32> to vector<32x128xf32>
    %5 = arith.addf %2, %4 : vector<32x128xf32>
    %cst_5 = arith.constant 0.000000e+00 : f32
    %6 = vector.broadcast %cst_5 : f32 to vector<32x128xf32>
    %7 = arith.maximumf %5, %6 : vector<32x128xf32>
    %8 = arith.truncf %7 : vector<32x128xf32> to vector<32x128xbf16>
    %c0_6 = arith.constant 0 : index
    %c0_7 = arith.constant 0 : index
    %9 = vector.load %arg5[%c0_6, %c0_7] : memref<32x128xbf16, #tpu.memory_space<vmem>>, vector<32x128xbf16>
    tpu.vector_store %arg5[%c0_6, %c0_7], %8 {strides = array<i32>} : memref<32x128xbf16, #tpu.memory_space<vmem>>, vector<32x128xbf16>,
    return
  }
  func.func @transform_0(%arg0: i32, %arg1: i32) -> (i32, i32) {
    %c0_i32 = arith.constant 0 : i32
    %c0_i32_0 = arith.constant 0 : i32
    return %arg0, %c0_i32 : i32, i32
  }
  func.func @transform_1(%arg0: i32, %arg1: i32) -> (i32, i32) {
    %c0_i32 = arith.constant 0 : i32
    %c0_i32_0 = arith.constant 0 : i32
    return %c0_i32, %arg1 : i32, i32
  }
  func.func @transform_2(%arg0: i32, %arg1: i32) -> (i32, i32) {
    %c0_i32 = arith.constant 0 : i32
    %c0_i32_0 = arith.constant 0 : i32
    return %c0_i32, %arg1 : i32, i32
  }
  func.func @transform_3(%arg0: i32, %arg1: i32) -> (i32, i32) {
    %c0_i32 = arith.constant 0 : i32
    return %arg0, %arg1 : i32, i32
  }
}

module attributes {stable_mosaic.version = 11 : i64} {
  func.func @_head_kernel(%arg0: i32, %arg1: i32, %arg2: memref<1x16x16xbf16, #tpu.memory_space<vmem>>, %arg3: memref<8x16xbf16, #tpu.memory_space<vmem>>, %arg4: memref<8x1xf32, #tpu.memory_space<vmem>>, %arg5: memref<8x4xbf16, #tpu.memory_space<vmem>>, %arg6: memref<4x128xbf16, #tpu.memory_space<vmem>>, %arg7: memref<1x8x8x128xf32, #tpu.memory_space<vmem>>) attributes {dimension_semantics = [#tpu.dimension_semantics<parallel>, #tpu.dimension_semantics<parallel>], iteration_bounds = array<i64: 2, 2>, scalar_prefetch = 0 : i64, scratch_operands = 0 : i64, tpu.core_type = #tpu.core_type<tc>, window_params = [{transform_indices = @transform_0, window_bounds = array<i64: 1, 16, 16>}, {pipeline_mode = #tpu.pipeline_mode<synchronous>, transform_indices = @transform_1, window_bounds = array<i64: 8, 16>}, {pipeline_mode = #tpu.pipeline_mode<synchronous>, transform_indices = @transform_2, window_bounds = array<i64: 8, 1>}, {transform_indices = @transform_3, window_bounds = array<i64: 8, 4>}, {pipeline_mode = #tpu.pipeline_mode<synchronous>, transform_indices = @transform_4, window_bounds = array<i64: 4, 128>}, {transform_indices = @transform_5, window_bounds = array<i64: 1, 8, 8, 128>}]} {
    %c0 = arith.constant 0 : index
    %c0_0 = arith.constant 0 : index
    %0 = vector.load %arg3[%c0, %c0_0] : memref<8x16xbf16, #tpu.memory_space<vmem>>, vector<8x16xbf16>
    %c0_1 = arith.constant 0 : index
    %c0_2 = arith.constant 0 : index
    %c0_3 = arith.constant 0 : index
    %1 = vector.load %arg2[%c0_1, %c0_2, %c0_3] : memref<1x16x16xbf16, #tpu.memory_space<vmem>>, vector<1x16x16xbf16>
    %2 = vector.shape_cast %1 : vector<1x16x16xbf16> to vector<16x16xbf16>
    %cst = arith.constant dense<0.000000e+00> : vector<8x16xf32>
    %3 = tpu.matmul %0, %2, %cst {dimension_numbers = #tpu.dot_dimension_numbers<[1], [0], [0], [1], [0, 0, 1, 1], [], []>} : vector<8x16xbf16>, vector<16x16xbf16>, vector<8x16xf32> -> vector<8x16xf32>
    %c0_4 = arith.constant 0 : index
    %c0_5 = arith.constant 0 : index
    %4 = vector.load %arg4[%c0_4, %c0_5] : memref<8x1xf32, #tpu.memory_space<vmem>>, vector<8x1xf32>
    %5 = vector.broadcast %4 : vector<8x1xf32> to vector<8x16xf32>
    %6 = arith.addf %3, %5 : vector<8x16xf32>
    %7 = vector.shape_cast %6 : vector<8x16xf32> to vector<8x4x4xf32>
    %8 = arith.truncf %7 : vector<8x4x4xf32> to vector<8x4x4xbf16>
    %c0_6 = arith.constant 0 : index
    %c0_7 = arith.constant 0 : index
    %9 = vector.load %arg5[%c0_6, %c0_7] : memref<8x4xbf16, #tpu.memory_space<vmem>>, vector<8x4xbf16>
    %10 = vector.shape_cast %9 : vector<8x4xbf16> to vector<1x8x4xbf16>
    %11 = vector.shape_cast %10 : vector<1x8x4xbf16> to vector<1x8x4xbf16>
    %12 = vector.broadcast %11 : vector<1x8x4xbf16> to vector<8x8x4xbf16>
    "tpu.trace_start"() <{level = 10 : i32, message = "cth,chw->ctw"}> : () -> ()
    %cst_8 = arith.constant dense<0.000000e+00> : vector<8x8x4xf32>
    %13 = tpu.matmul %12, %8, %cst_8 {dimension_numbers = #tpu.dot_dimension_numbers<[2], [1], [1], [2], [0, 0, 0, 1, 1, 2], [0], [0]>} : vector<8x8x4xbf16>, vector<8x4x4xbf16>, vector<8x8x4xf32> -> vector<8x8x4xf32>
    "tpu.trace_stop"() : () -> ()
    %14 = vector.shape_cast %13 : vector<8x8x4xf32> to vector<64x4xf32>
    %15 = arith.truncf %14 : vector<64x4xf32> to vector<64x4xbf16>
    %c0_9 = arith.constant 0 : index
    %c0_10 = arith.constant 0 : index
    %16 = vector.load %arg6[%c0_9, %c0_10] : memref<4x128xbf16, #tpu.memory_space<vmem>>, vector<4x128xbf16>
    %cst_11 = arith.constant dense<0.000000e+00> : vector<64x128xf32>
    %17 = tpu.matmul %15, %16, %cst_11 {dimension_numbers = #tpu.dot_dimension_numbers<[1], [0], [0], [1], [0, 0, 1, 1], [], []>} : vector<64x4xbf16>, vector<4x128xbf16>, vector<64x128xf32> -> vector<64x128xf32>
    %18 = vector.shape_cast %17 : vector<64x128xf32> to vector<8x8x128xf32>
    %c0_12 = arith.constant 0 : index
    %c0_13 = arith.constant 0 : index
    %c0_14 = arith.constant 0 : index
    %c0_15 = arith.constant 0 : index
    %19 = vector.load %arg7[%c0_12, %c0_13, %c0_14, %c0_15] : memref<1x8x8x128xf32, #tpu.memory_space<vmem>>, vector<1x8x8x128xf32>
    %20 = vector.shape_cast %19 : vector<1x8x8x128xf32> to vector<8x8x128xf32>
    %21 = vector.shape_cast %18 : vector<8x8x128xf32> to vector<1x8x8x128xf32>
    tpu.vector_store %arg7[%c0_12, %c0_13, %c0_14, %c0_15], %21 {strides = array<i32>} : memref<1x8x8x128xf32, #tpu.memory_space<vmem>>, vector<1x8x8x128xf32>,
    return
  }
  func.func @transform_0(%arg0: i32, %arg1: i32) -> (i32, i32, i32) {
    %c0_i32 = arith.constant 0 : i32
    %c0_i32_0 = arith.constant 0 : i32
    %c0_i32_1 = arith.constant 0 : i32
    return %arg0, %c0_i32, %c0_i32_0 : i32, i32, i32
  }
  func.func @transform_1(%arg0: i32, %arg1: i32) -> (i32, i32) {
    %c0_i32 = arith.constant 0 : i32
    %c0_i32_0 = arith.constant 0 : i32
    %c0_i32_1 = arith.constant 0 : i32
    return %c0_i32, %c0_i32_0 : i32, i32
  }
  func.func @transform_2(%arg0: i32, %arg1: i32) -> (i32, i32) {
    %c0_i32 = arith.constant 0 : i32
    %c0_i32_0 = arith.constant 0 : i32
    %c0_i32_1 = arith.constant 0 : i32
    return %c0_i32, %c0_i32_0 : i32, i32
  }
  func.func @transform_3(%arg0: i32, %arg1: i32) -> (i32, i32) {
    %c0_i32 = arith.constant 0 : i32
    %c0_i32_0 = arith.constant 0 : i32
    return %arg1, %c0_i32 : i32, i32
  }
  func.func @transform_4(%arg0: i32, %arg1: i32) -> (i32, i32) {
    %c0_i32 = arith.constant 0 : i32
    %c0_i32_0 = arith.constant 0 : i32
    %c0_i32_1 = arith.constant 0 : i32
    return %c0_i32, %c0_i32_0 : i32, i32
  }
  func.func @transform_5(%arg0: i32, %arg1: i32) -> (i32, i32, i32, i32) {
    %c0_i32 = arith.constant 0 : i32
    %c0_i32_0 = arith.constant 0 : i32
    %c0_i32_1 = arith.constant 0 : i32
    return %arg0, %c0_i32, %arg1, %c0_i32_0 : i32, i32, i32, i32
  }
}

module attributes {stable_mosaic.version = 11 : i64} {
  func.func @_head_kernel(%arg0: i32, %arg1: i32, %arg2: memref<1x8x64xbf16, #tpu.memory_space<vmem>>, %arg3: memref<8x8xbf16, #tpu.memory_space<vmem>>, %arg4: memref<8x1xf32, #tpu.memory_space<vmem>>, %arg5: memref<8x8xbf16, #tpu.memory_space<vmem>>, %arg6: memref<8x128xbf16, #tpu.memory_space<vmem>>, %arg7: memref<1x8x8x128xf32, #tpu.memory_space<vmem>>) attributes {dimension_semantics = [#tpu.dimension_semantics<parallel>, #tpu.dimension_semantics<parallel>], iteration_bounds = array<i64: 2, 2>, scalar_prefetch = 0 : i64, scratch_operands = 0 : i64, tpu.core_type = #tpu.core_type<tc>, window_params = [{transform_indices = @transform_0, window_bounds = array<i64: 1, 8, 64>}, {pipeline_mode = #tpu.pipeline_mode<synchronous>, transform_indices = @transform_1, window_bounds = array<i64: 8, 8>}, {pipeline_mode = #tpu.pipeline_mode<synchronous>, transform_indices = @transform_2, window_bounds = array<i64: 8, 1>}, {transform_indices = @transform_3, window_bounds = array<i64: 8, 8>}, {pipeline_mode = #tpu.pipeline_mode<synchronous>, transform_indices = @transform_4, window_bounds = array<i64: 8, 128>}, {transform_indices = @transform_5, window_bounds = array<i64: 1, 8, 8, 128>}]} {
    %c0 = arith.constant 0 : index
    %c0_0 = arith.constant 0 : index
    %0 = vector.load %arg3[%c0, %c0_0] : memref<8x8xbf16, #tpu.memory_space<vmem>>, vector<8x8xbf16>
    %c0_1 = arith.constant 0 : index
    %c0_2 = arith.constant 0 : index
    %c0_3 = arith.constant 0 : index
    %1 = vector.load %arg2[%c0_1, %c0_2, %c0_3] : memref<1x8x64xbf16, #tpu.memory_space<vmem>>, vector<1x8x64xbf16>
    %2 = vector.shape_cast %1 : vector<1x8x64xbf16> to vector<8x64xbf16>
    %cst = arith.constant dense<0.000000e+00> : vector<8x64xf32>
    %3 = tpu.matmul %0, %2, %cst {dimension_numbers = #tpu.dot_dimension_numbers<[1], [0], [0], [1], [0, 0, 1, 1], [], []>} : vector<8x8xbf16>, vector<8x64xbf16>, vector<8x64xf32> -> vector<8x64xf32>
    %c0_4 = arith.constant 0 : index
    %c0_5 = arith.constant 0 : index
    %4 = vector.load %arg4[%c0_4, %c0_5] : memref<8x1xf32, #tpu.memory_space<vmem>>, vector<8x1xf32>
    %5 = vector.broadcast %4 : vector<8x1xf32> to vector<8x64xf32>
    %6 = arith.addf %3, %5 : vector<8x64xf32>
    %7 = vector.shape_cast %6 : vector<8x64xf32> to vector<8x8x8xf32>
    %8 = arith.truncf %7 : vector<8x8x8xf32> to vector<8x8x8xbf16>
    %c0_6 = arith.constant 0 : index
    %c0_7 = arith.constant 0 : index
    %9 = vector.load %arg5[%c0_6, %c0_7] : memref<8x8xbf16, #tpu.memory_space<vmem>>, vector<8x8xbf16>
    %10 = vector.shape_cast %9 : vector<8x8xbf16> to vector<1x8x8xbf16>
    %11 = vector.shape_cast %10 : vector<1x8x8xbf16> to vector<1x8x8xbf16>
    %12 = vector.broadcast %11 : vector<1x8x8xbf16> to vector<8x8x8xbf16>
    "tpu.trace_start"() <{level = 10 : i32, message = "cth,chw->ctw"}> : () -> ()
    %cst_8 = arith.constant dense<0.000000e+00> : vector<8x8x8xf32>
    %13 = tpu.matmul %12, %8, %cst_8 {dimension_numbers = #tpu.dot_dimension_numbers<[2], [1], [1], [2], [0, 0, 0, 1, 1, 2], [0], [0]>} : vector<8x8x8xbf16>, vector<8x8x8xbf16>, vector<8x8x8xf32> -> vector<8x8x8xf32>
    "tpu.trace_stop"() : () -> ()
    %14 = vector.shape_cast %13 : vector<8x8x8xf32> to vector<64x8xf32>
    %15 = arith.truncf %14 : vector<64x8xf32> to vector<64x8xbf16>
    %c0_9 = arith.constant 0 : index
    %c0_10 = arith.constant 0 : index
    %16 = vector.load %arg6[%c0_9, %c0_10] : memref<8x128xbf16, #tpu.memory_space<vmem>>, vector<8x128xbf16>
    %cst_11 = arith.constant dense<0.000000e+00> : vector<64x128xf32>
    %17 = tpu.matmul %15, %16, %cst_11 {dimension_numbers = #tpu.dot_dimension_numbers<[1], [0], [0], [1], [0, 0, 1, 1], [], []>} : vector<64x8xbf16>, vector<8x128xbf16>, vector<64x128xf32> -> vector<64x128xf32>
    %18 = vector.shape_cast %17 : vector<64x128xf32> to vector<8x8x128xf32>
    %c0_12 = arith.constant 0 : index
    %c0_13 = arith.constant 0 : index
    %c0_14 = arith.constant 0 : index
    %c0_15 = arith.constant 0 : index
    %19 = vector.load %arg7[%c0_12, %c0_13, %c0_14, %c0_15] : memref<1x8x8x128xf32, #tpu.memory_space<vmem>>, vector<1x8x8x128xf32>
    %20 = vector.shape_cast %19 : vector<1x8x8x128xf32> to vector<8x8x128xf32>
    %21 = vector.shape_cast %18 : vector<8x8x128xf32> to vector<1x8x8x128xf32>
    tpu.vector_store %arg7[%c0_12, %c0_13, %c0_14, %c0_15], %21 {strides = array<i32>} : memref<1x8x8x128xf32, #tpu.memory_space<vmem>>, vector<1x8x8x128xf32>,
    return
  }
  func.func @transform_0(%arg0: i32, %arg1: i32) -> (i32, i32, i32) {
    %c0_i32 = arith.constant 0 : i32
    %c0_i32_0 = arith.constant 0 : i32
    %c0_i32_1 = arith.constant 0 : i32
    return %arg0, %c0_i32, %c0_i32_0 : i32, i32, i32
  }
  func.func @transform_1(%arg0: i32, %arg1: i32) -> (i32, i32) {
    %c0_i32 = arith.constant 0 : i32
    %c0_i32_0 = arith.constant 0 : i32
    %c0_i32_1 = arith.constant 0 : i32
    return %c0_i32, %c0_i32_0 : i32, i32
  }
  func.func @transform_2(%arg0: i32, %arg1: i32) -> (i32, i32) {
    %c0_i32 = arith.constant 0 : i32
    %c0_i32_0 = arith.constant 0 : i32
    %c0_i32_1 = arith.constant 0 : i32
    return %c0_i32, %c0_i32_0 : i32, i32
  }
  func.func @transform_3(%arg0: i32, %arg1: i32) -> (i32, i32) {
    %c0_i32 = arith.constant 0 : i32
    %c0_i32_0 = arith.constant 0 : i32
    return %arg1, %c0_i32 : i32, i32
  }
  func.func @transform_4(%arg0: i32, %arg1: i32) -> (i32, i32) {
    %c0_i32 = arith.constant 0 : i32
    %c0_i32_0 = arith.constant 0 : i32
    %c0_i32_1 = arith.constant 0 : i32
    return %c0_i32, %c0_i32_0 : i32, i32
  }
  func.func @transform_5(%arg0: i32, %arg1: i32) -> (i32, i32, i32, i32) {
    %c0_i32 = arith.constant 0 : i32
    %c0_i32_0 = arith.constant 0 : i32
    %c0_i32_1 = arith.constant 0 : i32
    return %arg0, %c0_i32, %arg1, %c0_i32_0 : i32, i32, i32, i32
  }
}

</mosaic_0001>

<bundles_post_ra>
// kernel: deeplabv3_forward.4
= control target key start
LH: loop header
LB: loop body
LE: loop exit
PB: predicated region body
PF: predicated region fallthrough
CT: control target
= control target key end

     0   :  { %vm123_vm0 = vcmask 1041408   ;;  %vm98_vm1 = vcmask 293888   ;;  %s563_s1 = inlined_call_operand.vmem [shape: bf16[36,128], index: 1, kind: input, shape index: {}]   ;;  %s564_s0 = inlined_call_operand.vmem [shape: bf16[128,36], index: 0, kind: input, shape index: {}]   ;;  %s565_s2 = inlined_call_operand.vmem [shape: f32[1,128], index: 2, kind: input, shape index: {}]   ;;  %s566_s3 = inlined_call_operand.vmem [shape: bf16[128,128], index: 3, kind: output, shape index: {}]  }
   0x1   :  { %v464_v0 = vld [vmem:[%s563_s1 + $0x10] ss:$0 sps:$4 sm:$0x33]   ;;  %v465_v1 = vld [vmem:[%s563_s1 + $0x8] sm:$0xff]   ;;  %v466_v3 = vld [vmem:[%s563_s1] sm:$0xff]  }
   0x2   :  { %462 = vmatprep.subr.msk.bf16.mxu0 %vm123_vm0, %v464_v0  ;;  %463 = vmatprep.subr.msk.bf16.mxu1 %vm123_vm0, %v464_v0  ;;  %v125_v2 = vsel %vm123_vm0, %v464_v0, 0  ;;  %v467_v4 = vld [vmem:[%s564_s0] sm:$0xff]   ;;  %v469_v6 = vld [vmem:[%s564_s0 + $0x8] sm:$0xff]   ;;  %v471_v8 = vld [vmem:[%s564_s0 + $0x10] sm:$0xff]  }
   0x3   :  { %435 = vmatpush3.bf16.msra.mxu0 %v125_v2  ;;  %459 = vmatpush3.bf16.msra.mxu1 %v125_v2  ;;  %v468_v5 = vld [vmem:[%s564_s0 + $0x20] sm:$0xff]   ;;  %v470_v7 = vld [vmem:[%s564_s0 + $0x28] sm:$0xff]   ;;  %v472_v9 = vld [vmem:[%s564_s0 + $0x30] sm:$0xff]  }
   0x4   :  { %436 = vmatprep.subr.bf16.mxu0 %v465_v1  ;;  %457 = vmatprep.subr.bf16.mxu1 %v465_v1  ;;  %v473_v10 = vld [vmem:[%s564_s0 + $0x18] sm:$0xff]   ;;  %v324_v12 = vld [vmem:[%s565_s2] ss:$0 sm:$0xff] }
   0x5   :  { %440 = vmatprep.mubr.msk.bf16.mxu0 %vm98_vm1, %v467_v4  ;;  %448 = vmatprep.mubr.msk.bf16.mxu1 %vm98_vm1, %v468_v5  ;;  %v474_v11 = vld [vmem:[%s564_s0 + $0x38] sm:$0xff]  }
   0x7   :  { %437 = vmatpush3.bf16.msra.mxu0 %v465_v1  ;;  %460 = vmatpush3.bf16.msra.mxu1 %v465_v1 }
   0x8   :  { %438 = vmatprep.subr.bf16.mxu0 %v466_v3  ;;  %458 = vmatprep.subr.bf16.mxu1 %v466_v3 }
   0xb   :  { %439 = vmatpush3.bf16.msra.mxu0 %v466_v3  ;;  %461 = vmatpush3.bf16.msra.mxu1 %v466_v3 }
   0xe   :  { %441 = vmatmul.mubr.msk.bf16.vlgmr.msra.gmra.mxu0 %vm98_vm1, %v469_v6  ;;  %449 = vmatmul.mubr.msk.bf16.vlgmr.msra.gmra.mxu1 %vm98_vm1, %v470_v7 }
   0xf   :  { %444 = vmatprep.mubr.msk.bf16.mxu0 %vm98_vm1, %v471_v8  ;;  %452 = vmatprep.mubr.msk.bf16.mxu1 %vm98_vm1, %v472_v9 }
  0x16   :  { %445 = vmatmul.mubr.msk.bf16.gmra.mxu0 %vm98_vm1, %v473_v10  ;;  %453 = vmatmul.mubr.msk.bf16.gmra.mxu1 %vm98_vm1, %v474_v11 }
  0xce   :  { %v442_v13 = vpop.f32.mrf.mxu0  ;;  %v450_v14 = vpop.f32.mrf.mxu1 }
  0xcf   :  { %v170_v15 = vadd.f32 %v442_v13, %v324_v12  ;;  %v202_v16 = vadd.f32 %v450_v14, %v324_v12 }
  0xd0   :  { %v161_v17 = vpop.f32.mrf.mxu0  ;;  %v193_v18 = vpop.f32.mrf.mxu1 }
  0xd1   :  { %v162_v19 = vadd.f32 %v324_v12, %v161_v17  ;;  %v194_v20 = vadd.f32 %v324_v12, %v193_v18  ;;  %v226_v25 = vmax.f32 %v170_v15, 0.0  ;;  %v234_v26 = vmax.f32 %v202_v16, 0.0 }
  0xd2   :  { %v443_v21 = vpop.f32.mrf.mxu0  ;;  %v451_v22 = vpop.f32.mrf.mxu1 }
  0xd3   :  { %v173_v23 = vadd.f32 %v443_v21, %v324_v12  ;;  %v205_v24 = vadd.f32 %v451_v22, %v324_v12  ;;  %v224_v33 = vmax.f32 %v162_v19, 0.0  ;;  %v232_v34 = vmax.f32 %v194_v20, 0.0 }
  0xd4   :  { %v164_v27 = vpop.f32.mrf.mxu0  ;;  %v196_v28 = vpop.f32.mrf.mxu1 }
  0xd5   :  { %v227_v29 = vmax.f32 %v173_v23, 0.0  ;;  %v235_v30 = vmax.f32 %v205_v24, 0.0  ;;  %v165_v31 = vadd.f32 %v324_v12, %v164_v27  ;;  %v197_v32 = vadd.f32 %v324_v12, %v196_v28 }
  0xd6   :  { %v446_v35 = vpop.f32.mrf.mxu0  ;;  %v454_v36 = vpop.f32.mrf.mxu1 }
  0xd7   :  { %v384_v37 = vpack.c.bf16 %v227_v29, %v226_v25  ;;  %v404_v38 = vpack.c.bf16 %v235_v30, %v234_v26  ;;  %v225_v39 = vmax.f32 %v165_v31, 0.0  ;;  %v233_v40 = vmax.f32 %v197_v32, 0.0 }
  0xd8   :  { %v186_v41 = vadd.f32 %v446_v35, %v324_v12  ;;  %v218_v42 = vadd.f32 %v454_v36, %v324_v12  ;;  %v177_v43 = vpop.f32.mrf.mxu0  ;;  %v209_v44 = vpop.f32.mrf.mxu1 }
  0xd9   :  { %416 = vst [vmem:[%s566_s3 + $0x8] sm:$0xff] %v384_v37   ;;  %420 = vst [vmem:[%s566_s3 + $0x28] sm:$0xff] %v404_v38   ;;  %v379_v45 = vpack.c.bf16 %v225_v39, %v224_v33  ;;  %v399_v46 = vpack.c.bf16 %v233_v40, %v232_v34  ;;  %v178_v47 = vadd.f32 %v324_v12, %v177_v43 }
  0xda   :  { %v210_v48 = vadd.f32 %v324_v12, %v209_v44  ;;  %v447_v49 = vpop.f32.mrf.mxu0  ;;  %v455_v50 = vpop.f32.mrf.mxu1  ;;  %v230_v53 = vmax.f32 %v186_v41, 0.0  ;;  %v238_v54 = vmax.f32 %v218_v42, 0.0 }
  0xdb   :  { %380 = vst [vmem:[%s566_s3] sm:$0xff] %v379_v45   ;;  %419 = vst [vmem:[%s566_s3 + $0x20] sm:$0xff] %v399_v46   ;;  %v189_v51 = vadd.f32 %v447_v49, %v324_v12  ;;  %v221_v52 = vadd.f32 %v455_v50, %v324_v12  ;;  %v228_v61 = vmax.f32 %v178_v47, 0.0 }
  0xdc   :  { %v180_v55 = vpop.f32.mrf.mxu0  ;;  %v212_v56 = vpop.f32.mrf.mxu1  ;;  %v236_v62 = vmax.f32 %v210_v48, 0.0 }
  0xdd   :  { %v231_v57 = vmax.f32 %v189_v51, 0.0  ;;  %v239_v58 = vmax.f32 %v221_v52, 0.0  ;;  %v181_v59 = vadd.f32 %v324_v12, %v180_v55  ;;  %v213_v60 = vadd.f32 %v324_v12, %v212_v56 }
  0xdf   :  { %v394_v63 = vpack.c.bf16 %v231_v57, %v230_v53  ;;  %v414_v0 = vpack.c.bf16 %v239_v58, %v238_v54  ;;  %v229_v1 = vmax.f32 %v181_v59, 0.0  ;;  %v237_v2 = vmax.f32 %v213_v60, 0.0 }
  0xe1   :  { %418 = vst [vmem:[%s566_s3 + $0x18] sm:$0xff] %v394_v63   ;;  %422 = vst [vmem:[%s566_s3 + $0x38] sm:$0xff] %v414_v0   ;;  %v389_v3 = vpack.c.bf16 %v229_v1, %v228_v61  ;;  %v409_v4 = vpack.c.bf16 %v237_v2, %v236_v62 }
  0xe3   :  { %417 = vst [vmem:[%s566_s3 + $0x10] sm:$0xff] %v389_v3   ;;  %421 = vst [vmem:[%s566_s3 + $0x30] sm:$0xff] %v409_v4  }

// kernel: deeplabv3_forward.5
= control target key start
LH: loop header
LB: loop body
LE: loop exit
PB: predicated region body
PF: predicated region fallthrough
CT: control target
= control target key end

     0   :  { %vm79_vm0 = vcmask 1043456   ;;  %vm72_vm1 = vcmask 588800   ;;  %s268_s1 = inlined_call_operand.vmem [shape: bf16[72,128], index: 1, kind: input, shape index: {}]   ;;  %s269_s0 = inlined_call_operand.vmem [shape: bf16[32,72], index: 0, kind: input, shape index: {}]   ;;  %s270_s2 = inlined_call_operand.vmem [shape: f32[1,128], index: 2, kind: input, shape index: {}]   ;;  %s271_s3 = inlined_call_operand.vmem [shape: bf16[32,128], index: 3, kind: output, shape index: {}]  }
   0x1   :  { %v211_v0 = vld [vmem:[%s268_s1 + $0x20] ss:$0 sps:$4 sm:$0xff]   ;;  %v212_v1 = vld [vmem:[%s268_s1 + $0x18] sm:$0xff]   ;;  %v213_v3 = vld [vmem:[%s268_s1 + $0x10] sm:$0xff]  }
   0x2   :  { %210 = vmatprep.subr.msk.bf16.mxu0 %vm79_vm0, %v211_v0  ;;  %v81_v2 = vsel %vm79_vm0, %v211_v0, 0  ;;  %v216_v4 = vld [vmem:[%s269_s0] sm:$0xff]   ;;  %v214_v5 = vld [vmem:[%s268_s1 + $0x8] sm:$0xff]  }
   0x3   :  { %197 = vmatpush3.bf16.msra.mxu0 %v81_v2  ;;  %206 = vmatprep.mubr.msk.bf16.mxu0 %vm72_vm1, %v216_v4  ;;  %v215_v6 = vld [vmem:[%s268_s1] sm:$0xff]   ;;  %v217_v7 = vld [vmem:[%s269_s0 + $0x8] sm:$0xff]  }
   0x4   :  { %198 = vmatprep.subr.bf16.mxu0 %v212_v1  ;;  %v160_v9 = vld [vmem:[%s270_s2] ss:$0 sm:$0xff] }
   0x7   :  { %199 = vmatpush3.bf16.msra.mxu0 %v212_v1 }
   0x8   :  { %200 = vmatprep.subr.bf16.mxu0 %v213_v3 }
   0xb   :  { %201 = vmatpush3.bf16.msra.mxu0 %v213_v3 }
   0xc   :  { %202 = vmatprep.subr.bf16.mxu0 %v214_v5 }
   0xf   :  { %203 = vmatpush3.bf16.msra.mxu0 %v214_v5 }
  0x10   :  { %204 = vmatprep.subr.bf16.mxu0 %v215_v6 }
  0x13   :  { %205 = vmatpush3.bf16.msra.mxu0 %v215_v6 }
  0x16   :  { %207 = vmatmul.mubr.msk.bf16.vlgmr.msra.gmra.mxu0 %vm72_vm1, %v217_v7 }
  0xd6   :  { %v208_v8 = vpop.f32.mrf.mxu0 }
  0xd7   :  { %v126_v11 = vadd.f32 %v208_v8, %v160_v9 }
  0xd8   :  { %v117_v10 = vpop.f32.mrf.mxu0 }
  0xd9   :  { %v118_v13 = vadd.f32 %v160_v9, %v117_v10  ;;  %v134_v16 = vmax.f32 %v126_v11, 0.0 }
  0xda   :  { %v209_v12 = vpop.f32.mrf.mxu0 }
  0xdb   :  { %v129_v14 = vadd.f32 %v209_v12, %v160_v9  ;;  %v132_v19 = vmax.f32 %v118_v13, 0.0 }
  0xdc   :  { %v120_v15 = vpop.f32.mrf.mxu0 }
  0xdd   :  { %v135_v17 = vmax.f32 %v129_v14, 0.0  ;;  %v121_v18 = vadd.f32 %v160_v9, %v120_v15 }
  0xdf   :  { %v186_v20 = vpack.c.bf16 %v135_v17, %v134_v16  ;;  %v133_v21 = vmax.f32 %v121_v18, 0.0 }
  0xe1   :  { %188 = vst [vmem:[%s271_s3 + $0x8] sm:$0xff] %v186_v20   ;;  %v181_v22 = vpack.c.bf16 %v133_v21, %v132_v19 }
  0xe3   :  { %182 = vst [vmem:[%s271_s3] sm:$0xff] %v181_v22  }

// kernel: deeplabv3_forward.6
= control target key start
LH: loop header
LB: loop body
LE: loop exit
PB: predicated region body
PF: predicated region fallthrough
CT: control target
= control target key end

     0   :  { %s1264_s18 = smov 0   ;;  %s1266_s19 = smov 0   ;;  %s1424_s0 = inlined_call_operand.vmem [shape: bf16[2,16,16], index: 0, kind: input, shape index: {}]   ;;  %s1425_s1 = inlined_call_operand.vmem [shape: bf16[8,16], index: 1, kind: input, shape index: {}]   ;;  %s1426_s2 = inlined_call_operand.vmem [shape: f32[8,1], index: 2, kind: input, shape index: {}]   ;;  %s1427_s3 = inlined_call_operand.vmem [shape: bf16[16,4], index: 3, kind: input, shape index: {}]   ;;  %s1428_s4 = inlined_call_operand.vmem [shape: bf16[4,128], index: 4, kind: input, shape index: {}]   ;;  %s1429_s5 = inlined_call_operand.vmem [shape: f32[2,8,16,128], index: 5, kind: output, shape index: {}]  }
   0x1   :  { %s1268_s20 = smov 0   ;;  %s1270_s21 = smov 0  }
   0x2   :  { %s1272_s22 = smov 0   ;;  %s1274_s23 = smov 0  }
   0x3   :  { %s1276_s24 = smov 0  }
   0x4 LB: > { %s24_s25 = sadd.s32 1, %s1216_s22  ;;  %s27_s26 = sadd.s32 1, %s1220_s23  ;;  %s1224_s24 = sphi %s1276_s24, %s15_s24   ;;  %s1220_s23 = sphi %s1274_s23, %s1436_s23   ;;  %s1216_s22 = sphi %s1272_s22, %s1435_s22   ;;  %s1212_s21 = sphi %s1270_s21, %s1434_s21   ;;  %s1208_s20 = sphi %s1268_s20, %s1433_s20   ;;  %s1204_s19 = sphi %s1266_s19, %s1432_s19   ;;  %s1200_s18 = sphi %s1264_s18, %s1431_s18  }
   0x5   : > { %p25_p0 = scmp.ge.s32.totalorder %s24_s25, 2  ;;  %s987_s27 = sadd.s32 4294967295, %s1224_s24  }
   0x6   : > { %p161_p1 = scmp.ne.s32.totalorder %s1204_s19, %s1200_s18  ;;  %p162_p2 = scmp.eq.s32.totalorder %s987_s27, 3 }
   0x7   : > { %s1438_s25 = smov (%p25_p0, %s24_s25), 0  ;;  %s1440_s26 = smov (!%p25_p0, %s27_s26), %s1220_s23 }
   0x8   : > { %s147_s28 = ssub.s32 %s1216_s22, %s1438_s25  ;;  %p29_p3 = scmp.ge.s32.totalorder %s1440_s26, 2 }
   0x9   : > { %p991_p4 = scmp.ge.s32.totalorder %s1224_s24, 1  ;;  %p1310_p5 = por %p162_p2, %p161_p1 }
   0xa   : > { %p210_p6 = scmp.lt.s32.totalorder %s1224_s24, 5  ;;  %s1442_s26 = smov (%p29_p3, %s1440_s26), 0 }
   0xb   : > { %s146_s30 = ssub.s32 %s1220_s23, %s1442_s26  ;;  %s151_s7 = sadd.s32 1, %s1204_s19 }
   0xc   : > { %p211_p7 = pnand %p991_p4, %p210_p6  ;;  %s148_s6 = sor.u32 %s147_s28, %s146_s30 }
   0xd   : > { %p149_p8 = scmp.eq.s32.totalorder %s148_s6, 0  ;;  %p241_p9 = scmp.lt.s32.totalorder (!%p211_p7), %s1212_s21, 1 }
   0xe   : > { %214 = sbr.rel (%p211_p7) target bundleno = 784 (0x310), region = 40  ;;  %s1229_s27 = smov (!%p211_p7), 120  }
   0xf   : > { %s1321_s8 = scalar_select %p149_p8, %s1204_s19, %s151_s7  }
  0x10   : > { %s1230_s28 = smov (!%p211_p7), 124   ;;  %s1231_s30 = smov (!%p211_p7), 116  }
  0x11   : > { %p246_p10 = scmp.lt.s32.totalorder (!%p211_p7), %s1208_s20, 1  ;;  %s238_s14 = sand.u32 (!%p211_p7), 1, %s1200_s18  }
  0x13   : > { %v1226_v0 = vmov 0.0   ;;  %vm1227_vm0 = vmmov 0   ;;  %v254_v1 = vld [vmem:[%s1426_s2] sm:$0xff]  ;;  %s242_s11 = scalar_select %p241_p9, %s1212_s21, 1  ;;  %v1228_v2 = vmov 0   ;;  %vm266_vm1 = vcmask 130048  }
  0x14   : > { %1039 = vmatprep.subr.bf16.mxu0 %v1226_v0  ;;  %1041 = vmatprep.mubr.msk.bf16.mxu0 %vm1227_vm0, %v1226_v0  ;;  %v251_v4 = vld [vmem:[%s1425_s1] sm:$0xf]  ;;  %v1232_v11 = vmov 1983009808   ;;  %v325_v13 = vlaneseq  ;;  %v1233_v16 = vmov 1934713408  }
  0x15   : > { %1168 = vset.pattern.permute.xlu0 %v1228_v2  ;;  %1045 = vmatprep.subr.bf16.mxu1 %v1226_v0  ;;  %s1015_s12 = sshll.u32 %s242_s11, 3  ;;  %v323_v12 = vunpack.c.l.s4 %v1232_v11  ;;  %v355_v17 = vunpack.c.l.s4 %v1233_v16  ;;  %vm401_vm2 = vcmask 1041408   ;;  %vm397_vm3 = vcmask 31744   ;;  %v750_v61 = vld [vmem:[%s1428_s4] sm:$0x3]  ;;  %s1011_s18 = sshll.u32 (%p1310_p5), %s1212_s21, 4 }
  0x16   : > { %257 = vperm.xlu0 %1168, %v254_v1   ;;  %1047 = vmatprep.mubr.msk.bf16.mxu1 %vm1227_vm0, %v1226_v0  ;;  %s245_s15 = scalar_lea.vmem %s1424_s0, %s1015_s12  ;;  %v326_v15 = vshrl.u32 %v325_v13, 7  ;;  %v764_v62 = vsel %vm401_vm2, %v750_v61, 0  ;;  %s847_s17 = sadd.s32 (%p1310_p5), %s1208_s20, %s1011_s18 }
  0x17   : > { %v1169_v3 = vld [vmem:[%s245_s15] sm:$0xff]   ;;  %v324_v14 = vunpack.c.0.s8 %v323_v12  ;;  %v356_v21 = vunpack.c.0.s8 %v355_v17  ;;  %s247_s6 = scalar_select %p246_p10, %s1208_s20, 1 }
  0x18   : > { %1040 = vmatpush3.bf16.msra.mxu0 %v1169_v3  ;;  %s992_s15 = sshll.u32 %s238_s14, 6 }
  0x19   : > { %1051 = vmatprep.subr.bf16.mxu0 %v1226_v0  ;;  %v327_v19 = vsub.s32 %v324_v14, %v326_v15  ;;  %v359_v28 = vsub.s32 %v356_v21, %v326_v15  ;;  %s995_s7 = sshll.u32 %s247_s6, 2  ;;  %s240_s16 = scalar_lea.vmem [#allocation2], %s992_s15 }
  0x1a   : > { %s249_s11 = scalar_lea.vmem %s1427_s3, %s995_s7 }
  0x1b   : > { %1042 = vmatmul.mubr.msk.bf16.vlgmr.msra.gmra.mxu0 %vm266_vm1, %v251_v4  ;;  %v396_v43 = vld [vmem:[%s249_s11] sm:$0xf] }
  0x1c   : > { %1053 = vmatprep.mubr.msk.bf16.mxu0 %vm1227_vm0, %v1226_v0 }
  0x91   : > { %v258_v5 = vpop.permute.xlu0 %257 }
  0xdb   : > { %v304_v6 = vpop.f32.mrf.mxu0 }
  0xdc   : > { %v305_v7 = vadd.f32 %v304_v6, %v258_v5 }
  0xdd   : > { %v1043_v8 = vpop.f32.mrf.mxu0 }
  0xde   : > { %314 = vrot.lane.b32.xlu1 %v305_v7, %s1229_s27  ;;  %311 = vrot.lane.b32.xlu0 %v305_v7, %s1230_s28  ;;  %s1012_s27 = sshll.u32 (%p1310_p5), %s847_s17, 3 }
  0xdf   : > { %v307_v9 = vpop.f32.mrf.mxu0  ;;  %s849_s6 = scalar_lea.vmem (%p1310_p5), %s1429_s5, %s1012_s27 }
  0xe1   : > { %v1044_v10 = vpop.f32.mrf.mxu0 }
  0xe2   : > { %317 = vrot.lane.b32.xlu1 %v305_v7, %s1231_s30 }
 0x150   : > { %v315_v18 = vpop.permute.xlu1 %314  ;;  %v312_v22 = vpop.permute.xlu0 %311 }
 0x151   : > { %v320_v20 = vcombine.low %v305_v7, %v315_v18  ;;  %v321_v26 = vcombine.high %v305_v7, %v315_v18 }
 0x153   : > { %v328_v27 = vrot.slane %v320_v20, %v327_v19  ;;  %v335_v33 = vrot.slane %v321_v26, %v327_v19 }
 0x154   : > { %v318_v23 = vpop.permute.xlu1 %317 }
 0x155   : > { %v336_v24 = vcombine.low %v312_v22, %v318_v23  ;;  %v337_v25 = vcombine.high %v312_v22, %v318_v23 }
 0x157   : > { %v344_v29 = vrot.slane %v336_v24, %v327_v19  ;;  %v351_v30 = vrot.slane %v337_v25, %v327_v19 }
 0x159   : > { %v352_v31 = vcombine.low %v328_v27, %v344_v29  ;;  %v353_v32 = vcombine.high %v328_v27, %v344_v29  ;;  %v368_v36 = vcombine.low %v335_v33, %v351_v30  ;;  %v369_v48 = vcombine.high %v335_v33, %v351_v30 }
 0x15b   : > { %v367_v34 = vrot.slane %v353_v32, %v359_v28  ;;  %v360_v35 = vrot.slane %v352_v31, %v359_v28  ;;  %v376_v44 = vrot.slane %v368_v36, %v359_v28  ;;  %v383_v52 = vrot.slane %v369_v48, %v359_v28 }
 0x15d   : > { %v388_v37 = vpack.c.bf16 %v360_v35, %v360_v35  ;;  %v384_v38 = vcombine.high %v360_v35, %v1226_v0  ;;  %v385_v39 = vcombine.high %v367_v34, %v1226_v0  ;;  %v390_v42 = vpack.c.bf16 %v367_v34, %v367_v34 }
 0x15e   : > { %v386_v50 = vcombine.high %v376_v44, %v1226_v0  ;;  %v392_v51 = vpack.c.bf16 %v376_v44, %v376_v44  ;;  %v387_v56 = vcombine.high %v383_v52, %v1226_v0  ;;  %v394_v57 = vpack.c.bf16 %v383_v52, %v383_v52 }
 0x15f   : > { %v403_v40 = vsel %vm401_vm2, %v388_v37, 0  ;;  %v389_v41 = vpack.c.bf16 %v384_v38, %v384_v38  ;;  %v391_v46 = vpack.c.bf16 %v385_v39, %v385_v39  ;;  %v489_v47 = vsel %vm401_vm2, %v390_v42, 0 }
 0x160   : > { %1046 = vmatpush3.bf16.msra.mxu1 %v403_v40  ;;  %v393_v53 = vpack.c.bf16 %v386_v50, %v386_v50  ;;  %v575_v54 = vsel %vm401_vm2, %v392_v51, 0  ;;  %v395_v58 = vpack.c.bf16 %v387_v56, %v387_v56  ;;  %v661_v59 = vsel %vm401_vm2, %v394_v57, 0 }
 0x161   : > { %v446_v45 = vsel %vm401_vm2, %v389_v41, 0  ;;  %1057 = vmatprep.subr.bf16.mxu1 %v1226_v0  ;;  %v532_v49 = vsel %vm401_vm2, %v391_v46, 0 }
 0x162   : > { %1052 = vmatpush3.bf16.msra.mxu0 %v446_v45  ;;  %v618_v55 = vsel %vm401_vm2, %v393_v53, 0  ;;  %v704_v60 = vsel %vm401_vm2, %v395_v58, 0 }
 0x163   : > { %1048 = vmatmul.mubr.msk.bf16.vlgmr.msra.gmra.mxu1 %vm397_vm3, %v396_v43  ;;  %1063 = vmatprep.subr.bf16.mxu0 %v1226_v0 }
 0x164   : > { %1058 = vmatpush3.bf16.msra.mxu1 %v489_v47  ;;  %1059 = vmatprep.mubr.msk.bf16.mxu1 %vm1227_vm0, %v1226_v0 }
 0x165   : > { %1054 = vmatmul.mubr.msk.bf16.vlgmr.msra.gmra.mxu0 %vm397_vm3, %v396_v43  ;;  %1069 = vmatprep.subr.bf16.mxu1 %v1226_v0 }
 0x166   : > { %1064 = vmatpush3.bf16.msra.mxu0 %v532_v49  ;;  %1065 = vmatprep.mubr.msk.bf16.mxu0 %vm1227_vm0, %v1226_v0 }
 0x167   : > { %1075 = vmatprep.subr.bf16.mxu0 %v1226_v0 }
 0x16b   : > { %1060 = vmatmul.mubr.msk.bf16.vlgmr.msra.gmra.mxu1 %vm397_vm3, %v396_v43 }
 0x16c   : > { %1070 = vmatpush3.bf16.msra.mxu1 %v575_v54  ;;  %1071 = vmatprep.mubr.msk.bf16.mxu1 %vm1227_vm0, %v1226_v0 }
 0x16d   : > { %1066 = vmatmul.mubr.msk.bf16.vlgmr.msra.gmra.mxu0 %vm397_vm3, %v396_v43  ;;  %1081 = vmatprep.subr.bf16.mxu1 %v1226_v0 }
 0x16e   : > { %1076 = vmatpush3.bf16.msra.mxu0 %v618_v55  ;;  %1077 = vmatprep.mubr.msk.bf16.mxu0 %vm1227_vm0, %v1226_v0 }
 0x16f   : > { %1087 = vmatprep.subr.bf16.mxu0 %v1226_v0 }
 0x173   : > { %1072 = vmatmul.mubr.msk.bf16.vlgmr.msra.gmra.mxu1 %vm397_vm3, %v396_v43 }
 0x174   : > { %1082 = vmatpush3.bf16.msra.mxu1 %v661_v59  ;;  %1083 = vmatprep.mubr.msk.bf16.mxu1 %vm1227_vm0, %v1226_v0 }
 0x175   : > { %1078 = vmatmul.mubr.msk.bf16.vlgmr.msra.gmra.mxu0 %vm397_vm3, %v396_v43  ;;  %1103 = vmatprep.subr.msk.bf16.mxu1 %vm401_vm2, %v750_v61 }
 0x176   : > { %1088 = vmatpush3.bf16.msra.mxu0 %v704_v60  ;;  %1089 = vmatprep.mubr.msk.bf16.mxu0 %vm1227_vm0, %v1226_v0 }
 0x17b   : > { %1084 = vmatmul.mubr.msk.bf16.vlgmr.msra.gmra.mxu1 %vm397_vm3, %v396_v43 }
 0x17c   : > { %1094 = vmatpush3.bf16.msra.mxu1 %v764_v62 }
 0x17d   : > { %1090 = vmatmul.mubr.msk.bf16.vlgmr.msra.gmra.mxu0 %vm397_vm3, %v396_v43 }
 0x223   : > { %v439_v63 = vpop.f32.mrf.mxu1 }
 0x225   : > { %v482_v1 = vpop.f32.mrf.mxu0  ;;  %v1049_v2 = vpop.f32.mrf.mxu1 }
 0x226   : > { %v746_v3 = vpack.c.bf16 %v482_v1, %v439_v63 }
 0x227   : > { %v1055_v4 = vpop.f32.mrf.mxu0  ;;  %v442_v5 = vpop.f32.mrf.mxu1 }
 0x228   : > { %1095 = vmatprep.mubr.msk.bf16.mxu1 %vm397_vm3, %v746_v3 }
 0x229   : > { %v485_v0 = vpop.f32.mrf.mxu0  ;;  %v1050_v6 = vpop.f32.mrf.mxu1 }
 0x22b   : > { %v1056_v7 = vpop.f32.mrf.mxu0  ;;  %v525_v8 = vpop.f32.mrf.mxu1 }
 0x22d   : > { %v568_v9 = vpop.f32.mrf.mxu0  ;;  %v1061_v10 = vpop.f32.mrf.mxu1 }
 0x22e   : > { %v747_v11 = vpack.c.bf16 %v568_v9, %v525_v8 }
 0x22f   : > { %v1067_v12 = vpop.f32.mrf.mxu0  ;;  %v528_v13 = vpop.f32.mrf.mxu1 }
 0x230   : > { %1096 = vmatmul.mubr.msk.bf16.vlgmr.msra.gmra.mxu1 %vm397_vm3, %v747_v11 }
 0x231   : > { %v571_v14 = vpop.f32.mrf.mxu0  ;;  %v1062_v15 = vpop.f32.mrf.mxu1 }
 0x233   : > { %v1068_v16 = vpop.f32.mrf.mxu0  ;;  %v611_v17 = vpop.f32.mrf.mxu1 }
 0x235   : > { %v654_v18 = vpop.f32.mrf.mxu0  ;;  %v1073_v19 = vpop.f32.mrf.mxu1 }
 0x236   : > { %v748_v20 = vpack.c.bf16 %v654_v18, %v611_v17 }
 0x237   : > { %v1079_v21 = vpop.f32.mrf.mxu0  ;;  %v614_v22 = vpop.f32.mrf.mxu1 }
 0x238   : > { %1099 = vmatprep.mubr.msk.bf16.mxu1 %vm397_vm3, %v748_v20 }
 0x239   : > { %v657_v23 = vpop.f32.mrf.mxu0  ;;  %v1074_v24 = vpop.f32.mrf.mxu1 }
 0x23b   : > { %v1080_v25 = vpop.f32.mrf.mxu0  ;;  %v697_v26 = vpop.f32.mrf.mxu1 }
 0x23d   : > { %v740_v27 = vpop.f32.mrf.mxu0  ;;  %v1085_v28 = vpop.f32.mrf.mxu1 }
 0x23e   : > { %v749_v29 = vpack.c.bf16 %v740_v27, %v697_v26 }
 0x23f   : > { %v1091_v30 = vpop.f32.mrf.mxu0  ;;  %v700_v31 = vpop.f32.mrf.mxu1 }
 0x240   : > { %1100 = vmatmul.mubr.msk.bf16.gmra.mxu1 %vm397_vm3, %v749_v29 }
 0x241   : > { %v743_v32 = vpop.f32.mrf.mxu0  ;;  %v1086_v33 = vpop.f32.mrf.mxu1 }
 0x243   : > { %v1092_v34 = vpop.f32.mrf.mxu0 }
 0x2f0   : > { %v1097_v35 = vpop.f32.mrf.mxu1 }
 0x2f1   : > { %833 = vst [vmem:[%s240_s16 + $0x10] sm:$0xff] %v1097_v35 }
 0x2f2   : > { %v800_v36 = vpop.f32.mrf.mxu1 }
 0x2f3   : > { %831 = vst [vmem:[%s240_s16] sm:$0xff] %v800_v36 }
 0x2f4   : > { %v1098_v37 = vpop.f32.mrf.mxu1 }
 0x2f5   : > { %834 = vst [vmem:[%s240_s16 + $0x18] sm:$0xff] %v1098_v37 }
 0x2f6   : > { %v803_v38 = vpop.f32.mrf.mxu1 }
 0x2f7   : > { %832 = vst [vmem:[%s240_s16 + $0x8] sm:$0xff] %v803_v38 }
 0x2f8   : > { %v896_v45 = vld [vmem:[%s240_s16 + $0x10] sm:$0xff] (%p1310_p5) }
 0x2f9   : > { %897 = vst [vmem:[%s849_s6 + $0x20] sm:$0xff] (%p1310_p5), %v896_v45 }
 0x2fa   : > { %v892_v43 = vld [vmem:[%s240_s16] sm:$0xff] (%p1310_p5) }
 0x2fb   : > { %893 = vst [vmem:[%s849_s6] sm:$0xff] (%p1310_p5), %v892_v43 }
 0x2fc   : > { %v898_v46 = vld [vmem:[%s240_s16 + $0x18] sm:$0xff] (%p1310_p5) }
 0x2fd   : > { %899 = vst [vmem:[%s849_s6 + $0x30] sm:$0xff] (%p1310_p5), %v898_v46 }
 0x2fe   : > { %v894_v44 = vld [vmem:[%s240_s16 + $0x8] sm:$0xff] (%p1310_p5) }
 0x2ff   : > { %895 = vst [vmem:[%s849_s6 + $0x10] sm:$0xff] (%p1310_p5), %v894_v44 }
 0x300   : > { %v1101_v39 = vpop.f32.mrf.mxu1 }
 0x301   : > { %837 = vst [vmem:[%s240_s16 + $0x30] sm:$0xff] %v1101_v39 }
 0x302   : > { %v816_v40 = vpop.f32.mrf.mxu1 }
 0x303   : > { %835 = vst [vmem:[%s240_s16 + $0x20] sm:$0xff] %v816_v40  ;;  %845 = sbr.rel (!%p1310_p5) target bundleno = 784 (0x310), region = 44 }
 0x304   : > { %v1102_v41 = vpop.f32.mrf.mxu1 }
 0x305   : > { %838 = vst [vmem:[%s240_s16 + $0x38] sm:$0xff] %v1102_v41 }
 0x306   : > { %v819_v42 = vpop.f32.mrf.mxu1 }
 0x307   : > { %836 = vst [vmem:[%s240_s16 + $0x28] sm:$0xff] %v819_v42 }
 0x308   : > { %v904_v49 = vld [vmem:[%s240_s16 + $0x30] sm:$0xff] }
 0x309   : > { %905 = vst [vmem:[%s849_s6 + $0x60] sm:$0xff] %v904_v49 }
 0x30a   : > { %v900_v47 = vld [vmem:[%s240_s16 + $0x20] sm:$0xff] }
 0x30b   : > { %901 = vst [vmem:[%s849_s6 + $0x40] sm:$0xff] %v900_v47 }
 0x30c   : > { %v906_v50 = vld [vmem:[%s240_s16 + $0x38] sm:$0xff] }
 0x30d   : > { %907 = vst [vmem:[%s849_s6 + $0x70] sm:$0xff] %v906_v50 }
 0x30e   : > { %v902_v48 = vld [vmem:[%s240_s16 + $0x28] sm:$0xff] }
 0x30f   : > { %903 = vst [vmem:[%s849_s6 + $0x50] sm:$0xff] %v902_v48 }
 0x310 PF: > { %s15_s24 = sadd.s32 1, %s1224_s24   ;;  %s1431_s18 = smov %s1204_s19 }
 0x311   : > { %p12_p11 = scmp.ge.s32.totalorder %s15_s24, 6   ;;  %s1432_s19 = smov %s1321_s8 }
 0x312   : > { %s1433_s20 = smov %s1216_s22  ;;  %s1434_s21 = smov %s1220_s23 }
 0x313   : > { %s1435_s22 = smov %s1438_s25  ;;  %s1436_s23 = smov %s1442_s26 }
 0x314   :  { %14 = sbr.rel (!%p12_p11) target bundleno = 4 (0x4), region = 111 }

// kernel: deeplabv3_forward.7
= control target key start
LH: loop header
LB: loop body
LE: loop exit
PB: predicated region body
PF: predicated region fallthrough
CT: control target
= control target key end

     0   :  { %s1340_s18 = smov 0   ;;  %s1342_s19 = smov 0   ;;  %s1498_s0 = inlined_call_operand.vmem [shape: bf16[2,8,64], index: 0, kind: input, shape index: {}]   ;;  %s1499_s1 = inlined_call_operand.vmem [shape: bf16[8,8], index: 1, kind: input, shape index: {}]   ;;  %s1500_s2 = inlined_call_operand.vmem [shape: f32[8,1], index: 2, kind: input, shape index: {}]   ;;  %s1501_s3 = inlined_call_operand.vmem [shape: bf16[16,8], index: 3, kind: input, shape index: {}]   ;;  %s1502_s4 = inlined_call_operand.vmem [shape: bf16[8,128], index: 4, kind: input, shape index: {}]   ;;  %s1503_s5 = inlined_call_operand.vmem [shape: f32[2,8,16,128], index: 5, kind: output, shape index: {}]  }
   0x1   :  { %s1344_s20 = smov 0   ;;  %s1346_s21 = smov 0  }
   0x2   :  { %s1348_s22 = smov 0   ;;  %s1350_s23 = smov 0  }
   0x3   :  { %s1352_s24 = smov 0  }
   0x4 LB: > { %s24_s25 = sadd.s32 1, %s1288_s22  ;;  %s27_s26 = sadd.s32 1, %s1292_s23  ;;  %s1296_s24 = sphi %s1352_s24, %s15_s24   ;;  %s1292_s23 = sphi %s1350_s23, %s1510_s23   ;;  %s1288_s22 = sphi %s1348_s22, %s1509_s22   ;;  %s1284_s21 = sphi %s1346_s21, %s1508_s21   ;;  %s1280_s20 = sphi %s1344_s20, %s1507_s20   ;;  %s1276_s19 = sphi %s1342_s19, %s1506_s19   ;;  %s1272_s18 = sphi %s1340_s18, %s1505_s18  }
   0x5   : > { %p25_p0 = scmp.ge.s32.totalorder %s24_s25, 2  ;;  %s1059_s27 = sadd.s32 4294967295, %s1296_s24  }
   0x6   : > { %p161_p1 = scmp.ne.s32.totalorder %s1276_s19, %s1272_s18  ;;  %p162_p2 = scmp.eq.s32.totalorder %s1059_s27, 3 }
   0x7   : > { %s1512_s25 = smov (%p25_p0, %s24_s25), 0  ;;  %s1514_s26 = smov (!%p25_p0, %s27_s26), %s1292_s23 }
   0x8   : > { %s147_s28 = ssub.s32 %s1288_s22, %s1512_s25  ;;  %p29_p3 = scmp.ge.s32.totalorder %s1514_s26, 2 }
   0x9   : > { %p1063_p4 = scmp.ge.s32.totalorder %s1296_s24, 1  ;;  %p1386_p5 = por %p162_p2, %p161_p1 }
   0xa   : > { %p209_p6 = scmp.lt.s32.totalorder %s1296_s24, 5  ;;  %s1516_s26 = smov (%p29_p3, %s1514_s26), 0 }
   0xb   : > { %s146_s30 = ssub.s32 %s1292_s23, %s1516_s26  ;;  %s151_s7 = sadd.s32 1, %s1276_s19 }
   0xc   : > { %p210_p7 = pnand %p1063_p4, %p209_p6  ;;  %s148_s6 = sor.u32 %s147_s28, %s146_s30 }
   0xd   : > { %p149_p8 = scmp.eq.s32.totalorder %s148_s6, 0  ;;  %p239_p9 = scmp.lt.s32.totalorder (!%p210_p7), %s1284_s21, 1 }
   0xe   : > { %213 = sbr.rel (%p210_p7) target bundleno = 793 (0x319), region = 40  ;;  %s1301_s27 = smov (!%p210_p7), 112  }
   0xf   : > { %s1397_s8 = scalar_select %p149_p8, %s1276_s19, %s151_s7  }
  0x10   : > { %s1302_s28 = smov (!%p210_p7), 120   ;;  %s1303_s30 = smov (!%p210_p7), 104  }
  0x11   : > { %s1304_s6 = smov (!%p210_p7), 96   ;;  %s1305_s7 = smov (!%p210_p7), 88  }
  0x12   : > { %s1306_s9 = smov (!%p210_p7), 80   ;;  %s1307_s10 = smov (!%p210_p7), 72  }
  0x13   : > { %v1298_v0 = vmov 0.0   ;;  %vm1299_vm0 = vmmov 0   ;;  %v250_v1 = vld [vmem:[%s1500_s2] sm:$0xff]  ;;  %s240_s11 = scalar_select %p239_p9, %s1284_s21, 1  ;;  %v1300_v2 = vmov 0   ;;  %vm260_vm1 = vcmask 1043456  }
  0x14   : > { %1108 = vmatprep.subr.bf16.mxu0 %v1298_v0  ;;  %1110 = vmatprep.mubr.msk.bf16.mxu0 %vm1299_vm0, %v1298_v0  ;;  %v248_v5 = vld [vmem:[%s1499_s1] sm:$0xf]  ;;  %vm256_vm2 = vcmask 64512   ;;  %v1308_v14 = vmov 1983009808   ;;  %v331_v16 = vlaneseq  ;;  %p243_p10 = scmp.lt.s32.totalorder %s1280_s20, 1 }
  0x15   : > { %1241 = vset.pattern.permute.xlu0 %v1300_v2  ;;  %1114 = vmatprep.subr.bf16.mxu1 %v1298_v0  ;;  %s1065_s12 = sshll.u32 %s240_s11, 2  ;;  %v329_v15 = vunpack.c.l.s4 %v1308_v14  ;;  %v1309_v21 = vmov 1934713408  }
  0x16   : > { %253 = vperm.xlu0 %1241, %v250_v1   ;;  %1116 = vmatprep.mubr.msk.bf16.mxu1 %vm1299_vm0, %v1298_v0  ;;  %s242_s15 = scalar_lea.vmem %s1498_s0, %s1065_s12  ;;  %v332_v20 = vshrl.u32 %v331_v16, 7  ;;  %v393_v22 = vunpack.c.l.s4 %v1309_v21 }
  0x17   : > { %v249_v3 = vld [vmem:[%s242_s15] sm:$0xf]  ;;  %v330_v19 = vunpack.c.0.s8 %v329_v15  ;;  %s244_s11 = scalar_select %p243_p10, %s1280_s20, 1 }
  0x18   : > { %v262_v4 = vsel %vm260_vm1, %v249_v3, 0  ;;  %v394_v28 = vunpack.c.0.s8 %v393_v22 }
  0x19   : > { %1109 = vmatpush3.bf16.msra.mxu0 %v262_v4  ;;  %v333_v26 = vsub.s32 %v330_v19, %v332_v20  ;;  %s1066_s12 = sshll.u32 %s244_s11, 2 }
  0x1a   : > { %1120 = vmatprep.subr.bf16.mxu0 %v1298_v0  ;;  %v397_v35 = vsub.s32 %v394_v28, %v332_v20  ;;  %s246_s15 = scalar_lea.vmem %s1501_s3, %s1066_s12 }
  0x1b   : > { %v470_v3 = vld [vmem:[%s246_s15] sm:$0xf] }
  0x1c   : > { %1111 = vmatmul.mubr.msk.bf16.vlgmr.msra.gmra.mxu0 %vm256_vm2, %v248_v5 }
  0x1d   : > { %1122 = vmatprep.mubr.msk.bf16.mxu0 %vm1299_vm0, %v1298_v0 }
  0x91   : > { %v254_v6 = vpop.permute.xlu0 %253 }
  0xdc   : > { %v298_v7 = vpop.f32.mrf.mxu0 }
  0xdd   : > { %v299_v8 = vadd.f32 %v298_v7, %v254_v6 }
  0xde   : > { %v1112_v9 = vpop.f32.mrf.mxu0 }
  0xdf   : > { %308 = vrot.lane.b32.xlu1 %v299_v8, %s1301_s27  ;;  %305 = vrot.lane.b32.xlu0 %v299_v8, %s1302_s28  ;;  %s236_s27 = sand.u32 1, %s1272_s18   ;;  %s1081_s18 = sshll.u32 (%p1386_p5), %s1284_s21, 4 }
  0xe0   : > { %v301_v10 = vpop.f32.mrf.mxu0  ;;  %s1064_s28 = sshll.u32 %s236_s27, 6 }
  0xe2   : > { %v1113_v11 = vpop.f32.mrf.mxu0 }
  0xe3   : > { %311 = vrot.lane.b32.xlu1 %v299_v8, %s1303_s30  ;;  %314 = vrot.lane.b32.xlu0 %v299_v8, %s1304_s6  ;;  %s238_s30 = scalar_lea.vmem [#allocation2], %s1064_s28  ;;  %s919_s6 = sadd.s32 (%p1386_p5), %s1280_s20, %s1081_s18 }
  0xe7   : > { %317 = vrot.lane.b32.xlu1 %v299_v8, %s1305_s7  ;;  %320 = vrot.lane.b32.xlu0 %v299_v8, %s1306_s9  ;;  %s1082_s7 = sshll.u32 (%p1386_p5), %s919_s6, 3 }
  0xe8   : > { %s921_s11 = scalar_lea.vmem (%p1386_p5), %s1503_s5, %s1082_s7 }
  0xeb   : > { %323 = vrot.lane.b32.xlu1 %v299_v8, %s1307_s10 }
 0x151   : > { %v309_v12 = vpop.permute.xlu1 %308  ;;  %v306_v13 = vpop.permute.xlu0 %305 }
 0x152   : > { %v326_v27 = vcombine.low %v299_v8, %v309_v12  ;;  %v327_v42 = vcombine.high %v299_v8, %v309_v12 }
 0x154   : > { %v334_v32 = vrot.slane %v326_v27, %v333_v26  ;;  %v341_v52 = vrot.slane %v327_v42, %v333_v26 }
 0x155   : > { %v312_v17 = vpop.permute.xlu1 %311  ;;  %v315_v18 = vpop.permute.xlu0 %314 }
 0x156   : > { %v342_v23 = vcombine.low %v306_v13, %v312_v17  ;;  %v343_v36 = vcombine.high %v306_v13, %v312_v17 }
 0x158   : > { %v350_v29 = vrot.slane %v342_v23, %v333_v26  ;;  %v357_v46 = vrot.slane %v343_v36, %v333_v26  ;;  %v822_v23 = vld [vmem:[%s1502_s4] sm:$0xf] }
 0x159   : > { %v318_v24 = vpop.permute.xlu1 %317  ;;  %v321_v25 = vpop.permute.xlu0 %320 }
 0x15a   : > { %v358_v30 = vcombine.low %v315_v18, %v321_v25  ;;  %v359_v37 = vcombine.high %v315_v18, %v321_v25  ;;  %v390_v38 = vcombine.low %v334_v32, %v350_v29  ;;  %v391_v39 = vcombine.high %v334_v32, %v350_v29 }
 0x15b   : > { %v406_v58 = vcombine.low %v341_v52, %v357_v46  ;;  %v407_v10 = vcombine.high %v341_v52, %v357_v46 }
 0x15c   : > { %v366_v40 = vrot.slane %v358_v30, %v333_v26  ;;  %v373_v47 = vrot.slane %v359_v37, %v333_v26  ;;  %v405_v48 = vrot.slane %v391_v39, %v397_v35  ;;  %v398_v50 = vrot.slane %v390_v38, %v397_v35 }
 0x15d   : > { %v324_v31 = vpop.permute.xlu1 %323  ;;  %v414_v4 = vrot.slane %v406_v58, %v397_v35  ;;  %v421_v14 = vrot.slane %v407_v10, %v397_v35 }
 0x15e   : > { %v374_v33 = vcombine.low %v318_v24, %v324_v31  ;;  %v375_v34 = vcombine.high %v318_v24, %v324_v31  ;;  %v836_v24 = vsel %vm260_vm1, %v822_v23, 0 }
 0x160   : > { %v382_v41 = vrot.slane %v374_v33, %v333_v26  ;;  %v389_v43 = vrot.slane %v375_v34, %v333_v26 }
 0x162   : > { %v422_v44 = vcombine.low %v366_v40, %v382_v41  ;;  %v423_v45 = vcombine.high %v366_v40, %v382_v41  ;;  %v438_v53 = vcombine.low %v373_v47, %v389_v43  ;;  %v439_v5 = vcombine.high %v373_v47, %v389_v43 }
 0x164   : > { %v437_v49 = vrot.slane %v423_v45, %v397_v35  ;;  %v430_v51 = vrot.slane %v422_v44, %v397_v35  ;;  %v446_v61 = vrot.slane %v438_v53, %v397_v35  ;;  %v453_v11 = vrot.slane %v439_v5, %v397_v35 }
 0x166   : > { %v454_v54 = vcombine.low %v398_v50, %v430_v51  ;;  %v455_v55 = vcombine.high %v398_v50, %v430_v51  ;;  %v456_v56 = vcombine.low %v405_v48, %v437_v49  ;;  %v457_v57 = vcombine.high %v405_v48, %v437_v49 }
 0x167   : > { %v458_v8 = vcombine.low %v414_v4, %v446_v61  ;;  %v459_v9 = vcombine.high %v414_v4, %v446_v61  ;;  %v460_v17 = vcombine.low %v421_v14, %v453_v11  ;;  %v461_v18 = vcombine.high %v421_v14, %v453_v11 }
 0x168   : > { %v462_v59 = vpack.c.bf16 %v454_v54, %v454_v54  ;;  %v463_v60 = vpack.c.bf16 %v455_v55, %v455_v55  ;;  %v464_v1 = vpack.c.bf16 %v456_v56, %v456_v56  ;;  %v465_v2 = vpack.c.bf16 %v457_v57, %v457_v57 }
 0x169   : > { %v466_v12 = vpack.c.bf16 %v458_v8, %v458_v8  ;;  %v467_v13 = vpack.c.bf16 %v459_v9, %v459_v9  ;;  %v468_v19 = vpack.c.bf16 %v460_v17, %v460_v17  ;;  %v469_v20 = vpack.c.bf16 %v461_v18, %v461_v18 }
 0x16a   : > { %v475_v62 = vsel %vm260_vm1, %v462_v59, 0  ;;  %v518_v63 = vsel %vm260_vm1, %v463_v60, 0  ;;  %v561_v6 = vsel %vm260_vm1, %v464_v1, 0  ;;  %v604_v7 = vsel %vm260_vm1, %v465_v2, 0 }
 0x16b   : > { %1115 = vmatpush3.bf16.msra.mxu1 %v475_v62  ;;  %1121 = vmatpush3.bf16.msra.mxu0 %v518_v63  ;;  %v647_v15 = vsel %vm260_vm1, %v466_v12, 0  ;;  %v690_v16 = vsel %vm260_vm1, %v467_v13, 0  ;;  %v733_v21 = vsel %vm260_vm1, %v468_v19, 0  ;;  %v776_v22 = vsel %vm260_vm1, %v469_v20, 0 }
 0x16c   : > { %1126 = vmatprep.subr.bf16.mxu1 %v1298_v0  ;;  %1132 = vmatprep.subr.bf16.mxu0 %v1298_v0 }
 0x16e   : > { %1117 = vmatmul.mubr.msk.bf16.vlgmr.msra.gmra.mxu1 %vm256_vm2, %v470_v3  ;;  %1123 = vmatmul.mubr.msk.bf16.vlgmr.msra.gmra.mxu0 %vm256_vm2, %v470_v3 }
 0x16f   : > { %1127 = vmatpush3.bf16.msra.mxu1 %v561_v6  ;;  %1133 = vmatpush3.bf16.msra.mxu0 %v604_v7 }
 0x170   : > { %1128 = vmatprep.mubr.msk.bf16.mxu1 %vm1299_vm0, %v1298_v0  ;;  %1134 = vmatprep.mubr.msk.bf16.mxu0 %vm1299_vm0, %v1298_v0 }
 0x171   : > { %1138 = vmatprep.subr.bf16.mxu1 %v1298_v0  ;;  %1144 = vmatprep.subr.bf16.mxu0 %v1298_v0 }
 0x176   : > { %1129 = vmatmul.mubr.msk.bf16.vlgmr.msra.gmra.mxu1 %vm256_vm2, %v470_v3  ;;  %1135 = vmatmul.mubr.msk.bf16.vlgmr.msra.gmra.mxu0 %vm256_vm2, %v470_v3 }
 0x177   : > { %1139 = vmatpush3.bf16.msra.mxu1 %v647_v15  ;;  %1145 = vmatpush3.bf16.msra.mxu0 %v690_v16 }
 0x178   : > { %1140 = vmatprep.mubr.msk.bf16.mxu1 %vm1299_vm0, %v1298_v0  ;;  %1146 = vmatprep.mubr.msk.bf16.mxu0 %vm1299_vm0, %v1298_v0 }
 0x179   : > { %1150 = vmatprep.subr.bf16.mxu1 %v1298_v0  ;;  %1156 = vmatprep.subr.bf16.mxu0 %v1298_v0 }
 0x17e   : > { %1141 = vmatmul.mubr.msk.bf16.vlgmr.msra.gmra.mxu1 %vm256_vm2, %v470_v3  ;;  %1147 = vmatmul.mubr.msk.bf16.vlgmr.msra.gmra.mxu0 %vm256_vm2, %v470_v3 }
 0x17f   : > { %1151 = vmatpush3.bf16.msra.mxu1 %v733_v21  ;;  %1157 = vmatpush3.bf16.msra.mxu0 %v776_v22 }
 0x180   : > { %1152 = vmatprep.mubr.msk.bf16.mxu1 %vm1299_vm0, %v1298_v0  ;;  %1158 = vmatprep.mubr.msk.bf16.mxu0 %vm1299_vm0, %v1298_v0 }
 0x181   : > { %1172 = vmatprep.subr.msk.bf16.mxu1 %vm260_vm1, %v822_v23 }
 0x186   : > { %1153 = vmatmul.mubr.msk.bf16.vlgmr.msra.gmra.mxu1 %vm256_vm2, %v470_v3  ;;  %1159 = vmatmul.mubr.msk.bf16.vlgmr.msra.gmra.mxu0 %vm256_vm2, %v470_v3 }
 0x187   : > { %1163 = vmatpush3.bf16.msra.mxu1 %v836_v24 }
 0x22e   : > { %v511_v25 = vpop.f32.mrf.mxu1  ;;  %v554_v26 = vpop.f32.mrf.mxu0 }
 0x22f   : > { %v818_v27 = vpack.c.bf16 %v554_v26, %v511_v25 }
 0x230   : > { %v1118_v28 = vpop.f32.mrf.mxu1  ;;  %v1124_v29 = vpop.f32.mrf.mxu0 }
 0x231   : > { %1164 = vmatprep.mubr.msk.bf16.mxu1 %vm256_vm2, %v818_v27 }
 0x232   : > { %v514_v0 = vpop.f32.mrf.mxu1  ;;  %v557_v30 = vpop.f32.mrf.mxu0 }
 0x234   : > { %v1119_v31 = vpop.f32.mrf.mxu1  ;;  %v1125_v32 = vpop.f32.mrf.mxu0 }
 0x236   : > { %v597_v33 = vpop.f32.mrf.mxu1  ;;  %v640_v34 = vpop.f32.mrf.mxu0 }
 0x237   : > { %v819_v35 = vpack.c.bf16 %v640_v34, %v597_v33 }
 0x238   : > { %v1130_v36 = vpop.f32.mrf.mxu1  ;;  %v1136_v37 = vpop.f32.mrf.mxu0 }
 0x239   : > { %1165 = vmatmul.mubr.msk.bf16.vlgmr.msra.gmra.mxu1 %vm256_vm2, %v819_v35 }
 0x23a   : > { %v600_v38 = vpop.f32.mrf.mxu1  ;;  %v643_v39 = vpop.f32.mrf.mxu0 }
 0x23c   : > { %v1131_v40 = vpop.f32.mrf.mxu1  ;;  %v1137_v41 = vpop.f32.mrf.mxu0 }
 0x23e   : > { %v683_v42 = vpop.f32.mrf.mxu1  ;;  %v726_v43 = vpop.f32.mrf.mxu0 }
 0x23f   : > { %v820_v44 = vpack.c.bf16 %v726_v43, %v683_v42 }
 0x240   : > { %v1142_v45 = vpop.f32.mrf.mxu1  ;;  %v1148_v46 = vpop.f32.mrf.mxu0 }
 0x241   : > { %1168 = vmatprep.mubr.msk.bf16.mxu1 %vm256_vm2, %v820_v44 }
 0x242   : > { %v686_v47 = vpop.f32.mrf.mxu1  ;;  %v729_v48 = vpop.f32.mrf.mxu0 }
 0x244   : > { %v1143_v49 = vpop.f32.mrf.mxu1  ;;  %v1149_v50 = vpop.f32.mrf.mxu0 }
 0x246   : > { %v769_v51 = vpop.f32.mrf.mxu1  ;;  %v812_v52 = vpop.f32.mrf.mxu0 }
 0x247   : > { %v821_v53 = vpack.c.bf16 %v812_v52, %v769_v51 }
 0x248   : > { %v1154_v54 = vpop.f32.mrf.mxu1  ;;  %v1160_v55 = vpop.f32.mrf.mxu0 }
 0x249   : > { %1169 = vmatmul.mubr.msk.bf16.gmra.mxu1 %vm256_vm2, %v821_v53 }
 0x24a   : > { %v772_v56 = vpop.f32.mrf.mxu1  ;;  %v815_v57 = vpop.f32.mrf.mxu0 }
 0x24c   : > { %v1155_v58 = vpop.f32.mrf.mxu1  ;;  %v1161_v59 = vpop.f32.mrf.mxu0 }
 0x2f9   : > { %v1166_v60 = vpop.f32.mrf.mxu1 }
 0x2fa   : > { %905 = vst [vmem:[%s238_s30 + $0x10] sm:$0xff] %v1166_v60 }
 0x2fb   : > { %v872_v61 = vpop.f32.mrf.mxu1 }
 0x2fc   : > { %903 = vst [vmem:[%s238_s30] sm:$0xff] %v872_v61 }
 0x2fd   : > { %v1167_v62 = vpop.f32.mrf.mxu1 }
 0x2fe   : > { %906 = vst [vmem:[%s238_s30 + $0x18] sm:$0xff] %v1167_v62 }
 0x2ff   : > { %v875_v63 = vpop.f32.mrf.mxu1 }
 0x300   : > { %904 = vst [vmem:[%s238_s30 + $0x8] sm:$0xff] %v875_v63 }
 0x301   : > { %v968_v7 = vld [vmem:[%s238_s30 + $0x10] sm:$0xff] (%p1386_p5) }
 0x302   : > { %969 = vst [vmem:[%s921_s11 + $0x20] sm:$0xff] (%p1386_p5), %v968_v7 }
 0x303   : > { %v964_v5 = vld [vmem:[%s238_s30] sm:$0xff] (%p1386_p5) }
 0x304   : > { %965 = vst [vmem:[%s921_s11] sm:$0xff] (%p1386_p5), %v964_v5 }
 0x305   : > { %v970_v8 = vld [vmem:[%s238_s30 + $0x18] sm:$0xff] (%p1386_p5) }
 0x306   : > { %971 = vst [vmem:[%s921_s11 + $0x30] sm:$0xff] (%p1386_p5), %v970_v8 }
 0x307   : > { %v966_v6 = vld [vmem:[%s238_s30 + $0x8] sm:$0xff] (%p1386_p5) }
 0x308   : > { %967 = vst [vmem:[%s921_s11 + $0x10] sm:$0xff] (%p1386_p5), %v966_v6 }
 0x309   : > { %v1170_v1 = vpop.f32.mrf.mxu1 }
 0x30a   : > { %909 = vst [vmem:[%s238_s30 + $0x30] sm:$0xff] %v1170_v1 }
 0x30b   : > { %v888_v2 = vpop.f32.mrf.mxu1 }
 0x30c   : > { %907 = vst [vmem:[%s238_s30 + $0x20] sm:$0xff] %v888_v2  ;;  %917 = sbr.rel (!%p1386_p5) target bundleno = 793 (0x319), region = 44 }
 0x30d   : > { %v1171_v3 = vpop.f32.mrf.mxu1 }
 0x30e   : > { %910 = vst [vmem:[%s238_s30 + $0x38] sm:$0xff] %v1171_v3 }
 0x30f   : > { %v891_v4 = vpop.f32.mrf.mxu1 }
 0x310   : > { %908 = vst [vmem:[%s238_s30 + $0x28] sm:$0xff] %v891_v4 }
 0x311   : > { %v976_v11 = vld [vmem:[%s238_s30 + $0x30] sm:$0xff] }
 0x312   : > { %977 = vst [vmem:[%s921_s11 + $0x60] sm:$0xff] %v976_v11 }
 0x313   : > { %v972_v9 = vld [vmem:[%s238_s30 + $0x20] sm:$0xff] }
 0x314   : > { %973 = vst [vmem:[%s921_s11 + $0x40] sm:$0xff] %v972_v9 }
 0x315   : > { %v978_v12 = vld [vmem:[%s238_s30 + $0x38] sm:$0xff] }
 0x316   : > { %979 = vst [vmem:[%s921_s11 + $0x70] sm:$0xff] %v978_v12 }
 0x317   : > { %v974_v10 = vld [vmem:[%s238_s30 + $0x28] sm:$0xff] }
 0x318   : > { %975 = vst [vmem:[%s921_s11 + $0x50] sm:$0xff] %v974_v10 }
 0x319 PF: > { %s15_s24 = sadd.s32 1, %s1296_s24   ;;  %s1505_s18 = smov %s1276_s19 }
 0x31a   : > { %p12_p11 = scmp.ge.s32.totalorder %s15_s24, 6   ;;  %s1506_s19 = smov %s1397_s8 }
 0x31b   : > { %s1507_s20 = smov %s1288_s22  ;;  %s1508_s21 = smov %s1292_s23 }
 0x31c   : > { %s1509_s22 = smov %s1512_s25  ;;  %s1510_s23 = smov %s1516_s26 }
 0x31d   :  { %14 = sbr.rel (!%p12_p11) target bundleno = 4 (0x4), region = 111 }

</bundles_post_ra>
